<compile_context>
chip_gen: v6e
topology: v6e:2x2x1
jax: 0.10.0
libtpu: 0.0.40
codegen_flags: <defaults>
</compile_context>

<pallas_src>
import functools

import jax
import jax.numpy as jnp
from jax.experimental import pallas as pl
from jax.experimental.pallas import tpu as pltpu


# ---------------------------------------------------------------------------
# Fused conv kernel: tap-wise accumulation over the kernel window.
#   x_ref : (Hp, Wp, Cin)            padded image for batch n (VMEM resident)
#   w_ref : (k*k, Cin, Cout_pad)     per-tap weights (resident, lane-padded)
#   b_ref : (1, Cout_pad)            lane-padded bias
#   o_ref : (tile_h, Wo, Cout_pad)   NHWC output tile (lane dense)
# ---------------------------------------------------------------------------
def _lora_conv_kernel(x_ref, w_ref, b_ref, o_ref, *,
                      k, stride, dilation, tile_h, wo):
    cp = o_ref.shape[-1]
    cin = x_ref.shape[-1]
    j = pl.program_id(1)                                   # output-row tile idx
    h_base = pl.multiple_of(j * (tile_h * stride), tile_h)  # first input row

    acc = jnp.zeros((tile_h * wo, cp), jnp.float32)
    for ki in range(k):                                    # unrolled k*k taps
        for kj in range(k):
            r0 = h_base + ki * dilation
            c0 = kj * dilation
            if stride == 1:
                rows = pl.ds(r0, tile_h)
                cols = pl.ds(c0, wo)
            else:
                rows = pl.ds(r0, tile_h, stride)
                cols = pl.ds(c0, wo, stride)
            xs = x_ref[rows, cols, :]                      # (tile_h, wo, Cin)
            xs2 = xs.reshape(tile_h * wo, cin)
            acc = acc + jnp.dot(xs2, w_ref[ki * k + kj],
                                preferred_element_type=jnp.float32)

    out = acc + b_ref[...]                                 # (1,Cp) broadcast
    o_ref[...] = out.reshape(tile_h, wo, cp).astype(o_ref.dtype)


# ---------------------------------------------------------------------------
# Wrapper: LoRA weight merge (plain jnp) + fused Pallas conv.
# ---------------------------------------------------------------------------
def lora_conv2d_forward(x, lora_A, lora_B, bias, scaling,
                        out_channels, in_channels, kernel_size,
                        stride=1, padding=0, dilation=1):
    k = kernel_size
    N, Cin, H, W = x.shape
    assert Cin == in_channels
    H_out = (H + 2 * padding - dilation * (k - 1) - 1) // stride + 1
    W_out = (W + 2 * padding - dilation * (k - 1) - 1) // stride + 1

    # Effective LoRA weight (tiny: far below one vreg tile) -> plain XLA.
    w_eff = ((lora_B @ lora_A).reshape(out_channels, in_channels, k, k)
             * scaling).astype(jnp.float32)

    # Lane-dense out-channels: pad to a multiple of 128 with zeros.
    LANE = 128
    cout_pad = ((out_channels + LANE - 1) // LANE) * LANE
    # w_taps[ki*k + kj, cin, cout] = w_eff[cout, cin, ki, kj]
    w_taps = w_eff.transpose(2, 3, 1, 0).reshape(k * k, in_channels,
                                                 out_channels)
    w_taps = jnp.pad(w_taps, ((0, 0), (0, 0), (0, cout_pad - out_channels)))
    b_pad = jnp.pad(bias.astype(jnp.float32),
                    (0, cout_pad - out_channels)).reshape(1, cout_pad)

    # NCHW -> NHWC once; spatial zero-pad once (channels on the lane axis).
    x_nhwc = jnp.transpose(x, (0, 2, 3, 1)).astype(jnp.float32)
    if padding:
        x_nhwc = jnp.pad(x_nhwc, ((0, 0), (padding, padding),
                                  (padding, padding), (0, 0)))
    Hp, Wp = x_nhwc.shape[1], x_nhwc.shape[2]

    # Output-row tile: largest divisor of H_out whose double-buffered output
    # block fits a conservative VMEM budget (safe on v7x's 64 MiB as well).
    budget = 8 * 1024 * 1024
    tile_h = 1
    for t in range(1, H_out + 1):
        if H_out % t == 0 and (t * W_out * cout_pad * 4) * 2 <= budget:
            tile_h = t
    n_ht = H_out // tile_h
    # TODO(synk): for very large feature maps the per-image (Hp, Wp, Cin) VMEM
    # block would need H-tiling with halo DMA; not needed at these sizes.

    kernel = functools.partial(_lora_conv_kernel, k=k, stride=stride,
                               dilation=dilation, tile_h=tile_h, wo=W_out)

    flops = 2 * N * H_out * W_out * in_channels * k * k * cout_pad
    bytes_accessed = 4 * (x_nhwc.size + w_taps.size + b_pad.size
                          + N * H_out * W_out * cout_pad)

    out = pl.pallas_call(
        kernel,
        out_shape=jax.ShapeDtypeStruct((N, H_out, W_out, cout_pad),
                                       jnp.float32),
        grid=(N, n_ht),
        in_specs=[
            # full padded image per batch element; block index depends only on
            # n, so it stays VMEM-resident across all H_out tiles of an image.
            pl.BlockSpec((pl.Squeezed(), Hp, Wp, in_channels),
                         lambda n, j: (n, 0, 0, 0)),
            pl.BlockSpec((k * k, in_channels, cout_pad),
                         lambda n, j: (0, 0, 0)),
            pl.BlockSpec((1, cout_pad), lambda n, j: (0, 0)),
        ],
        out_specs=pl.BlockSpec((pl.Squeezed(), tile_h, W_out, cout_pad),
                               lambda n, j: (n, j, 0, 0)),
        compiler_params=pltpu.CompilerParams(
            dimension_semantics=("parallel", "arbitrary"),
            vmem_limit_bytes=32 * 1024 * 1024),
        cost_estimate=pl.CostEstimate(flops=flops, transcendentals=0,
                                      bytes_accessed=bytes_accessed),
    )(x_nhwc, w_taps, b_pad)

    y = out[..., :out_channels]              # drop zero-padded channels first
    return jnp.transpose(y, (0, 3, 1, 2))    # NHWC -> NCHW


# ---------------------------------------------------------------------------
if __name__ == "__main__":
    key = jax.random.PRNGKey(0)
    N, Cin, H, W = 2, 4, 16, 16
    Cout, k = 8, 3
    r, lora_alpha = 2, 4
    stride, padding, dilation = 1, 1, 1
    scaling = lora_alpha / r

    k1, k2, k3, k4 = jax.random.split(key, 4)
    x = jax.random.normal(k1, (N, Cin, H, W), dtype=jnp.float32)

    # PyTorch init: lora_A kaiming_uniform(a=sqrt(5)); lora_B is zeros in the
    # module (initial output == bias).  lora_B gets small random values here so
    # the kernel computes a nontrivial conv; forward semantics are unchanged.
    fan_in = Cin * k
    bound = (1.0 / fan_in) ** 0.5
    lora_A = jax.random.uniform(k2, (k * r, Cin * k),
                                minval=-bound, maxval=bound, dtype=jnp.float32)
    lora_B = jax.random.normal(k3, (Cout * k, k * r), dtype=jnp.float32) * 0.1
    bias = jax.random.normal(k4, (Cout,), dtype=jnp.float32) * 0.1

    out = lora_conv2d_forward(x, lora_A, lora_B, bias, scaling,
                              Cout, Cin, k, stride, padding, dilation)
    out = jax.block_until_ready(out)

    # Pure-JAX reference (mirrors F.conv2d with the merged LoRA weight).
    w_ref = (lora_B @ lora_A).reshape(Cout, Cin, k, k) * scaling
    ref = jax.lax.conv_general_dilated(
        x, w_ref, window_strides=(stride, stride),
        padding=[(padding, padding), (padding, padding)],
        rhs_dilation=(dilation, dilation),
        dimension_numbers=("NCHW", "OIHW", "NCHW"))
    ref = ref + bias.reshape(1, Cout, 1, 1)

    assert out.shape == ref.shape == (N, Cout, H, W)
    assert jnp.allclose(out, ref, atol=1e-4, rtol=1e-4)
    print("KERNEL_OK")
</pallas_src>

<mosaic_0001>
module attributes {stable_mosaic.version = 11 : i64} {
  func.func @_lora_conv_kernel(%arg0: i32, %arg1: i32, %arg2: memref<1x18x18x4xf32, #tpu.memory_space<vmem>>, %arg3: memref<9x4x128xf32, #tpu.memory_space<vmem>>, %arg4: memref<1x128xf32, #tpu.memory_space<vmem>>, %arg5: memref<1x16x16x128xf32, #tpu.memory_space<vmem>>) attributes {dimension_semantics = [#tpu.dimension_semantics<parallel>, #tpu.dimension_semantics<arbitrary>], iteration_bounds = array<i64: 2, 1>, scalar_prefetch = 0 : i64, scratch_operands = 0 : i64, tpu.core_type = #tpu.core_type<tc>, window_params = [{transform_indices = @transform_0, window_bounds = array<i64: 1, 18, 18, 4>}, {pipeline_mode = #tpu.pipeline_mode<synchronous>, transform_indices = @transform_1, window_bounds = array<i64: 9, 4, 128>}, {pipeline_mode = #tpu.pipeline_mode<synchronous>, transform_indices = @transform_2, window_bounds = array<i64: 1, 128>}, {transform_indices = @transform_3, window_bounds = array<i64: 1, 16, 16, 128>}]} {
    %c16_i32 = arith.constant 16 : i32
    %0 = arith.muli %arg1, %c16_i32 : i32
    %1 = tpu.assume_multiple %0, 16 : i32
    %cst = arith.constant 0.000000e+00 : f32
    %2 = vector.broadcast %cst : f32 to vector<256x128xf32>
    %c0_i32 = arith.constant 0 : i32
    %3 = arith.addi %1, %c0_i32 : i32
    %c0 = arith.constant 0 : index
    %4 = arith.index_cast %3 : i32 to index
    %c0_0 = arith.constant 0 : index
    %c0_1 = arith.constant 0 : index
    %5 = vector.load %arg2[%c0, %4, %c0_0, %c0_1] : memref<1x18x18x4xf32, #tpu.memory_space<vmem>>, vector<1x16x16x4xf32>
    %6 = vector.shape_cast %5 : vector<1x16x16x4xf32> to vector<16x16x4xf32>
    %7 = vector.shape_cast %6 : vector<16x16x4xf32> to vector<256x4xf32>
    %c0_2 = arith.constant 0 : index
    %c0_3 = arith.constant 0 : index
    %c0_4 = arith.constant 0 : index
    %8 = vector.load %arg3[%c0_2, %c0_3, %c0_4] : memref<9x4x128xf32, #tpu.memory_space<vmem>>, vector<1x4x128xf32>
    %9 = vector.shape_cast %8 : vector<1x4x128xf32> to vector<4x128xf32>
    %cst_5 = arith.constant dense<0.000000e+00> : vector<256x128xf32>
    %10 = tpu.matmul %7, %9, %cst_5 {dimension_numbers = #tpu.dot_dimension_numbers<[1], [0], [0], [1], [0, 0, 1, 1], [], []>} : vector<256x4xf32>, vector<4x128xf32>, vector<256x128xf32> -> vector<256x128xf32>
    %11 = arith.addf %2, %10 : vector<256x128xf32>
    %c0_i32_6 = arith.constant 0 : i32
    %12 = arith.addi %1, %c0_i32_6 : i32
    %c0_7 = arith.constant 0 : index
    %13 = arith.index_cast %12 : i32 to index
    %c1 = arith.constant 1 : index
    %c0_8 = arith.constant 0 : index
    %14 = vector.load %arg2[%c0_7, %13, %c1, %c0_8] : memref<1x18x18x4xf32, #tpu.memory_space<vmem>>, vector<1x16x16x4xf32>
    %15 = vector.shape_cast %14 : vector<1x16x16x4xf32> to vector<16x16x4xf32>
    %16 = vector.shape_cast %15 : vector<16x16x4xf32> to vector<256x4xf32>
    %c1_9 = arith.constant 1 : index
    %c0_10 = arith.constant 0 : index
    %c0_11 = arith.constant 0 : index
    %17 = vector.load %arg3[%c1_9, %c0_10, %c0_11] : memref<9x4x128xf32, #tpu.memory_space<vmem>>, vector<1x4x128xf32>
    %18 = vector.shape_cast %17 : vector<1x4x128xf32> to vector<4x128xf32>
    %cst_12 = arith.constant dense<0.000000e+00> : vector<256x128xf32>
    %19 = tpu.matmul %16, %18, %cst_12 {dimension_numbers = #tpu.dot_dimension_numbers<[1], [0], [0], [1], [0, 0, 1, 1], [], []>} : vector<256x4xf32>, vector<4x128xf32>, vector<256x128xf32> -> vector<256x128xf32>
    %20 = arith.addf %11, %19 : vector<256x128xf32>
    %c0_i32_13 = arith.constant 0 : i32
    %21 = arith.addi %1, %c0_i32_13 : i32
    %c0_14 = arith.constant 0 : index
    %22 = arith.index_cast %21 : i32 to index
    %c2 = arith.constant 2 : index
    %c0_15 = arith.constant 0 : index
    %23 = vector.load %arg2[%c0_14, %22, %c2, %c0_15] : memref<1x18x18x4xf32, #tpu.memory_space<vmem>>, vector<1x16x16x4xf32>
    %24 = vector.shape_cast %23 : vector<1x16x16x4xf32> to vector<16x16x4xf32>
    %25 = vector.shape_cast %24 : vector<16x16x4xf32> to vector<256x4xf32>
    %c2_16 = arith.constant 2 : index
    %c0_17 = arith.constant 0 : index
    %c0_18 = arith.constant 0 : index
    %26 = vector.load %arg3[%c2_16, %c0_17, %c0_18] : memref<9x4x128xf32, #tpu.memory_space<vmem>>, vector<1x4x128xf32>
    %27 = vector.shape_cast %26 : vector<1x4x128xf32> to vector<4x128xf32>
    %cst_19 = arith.constant dense<0.000000e+00> : vector<256x128xf32>
    %28 = tpu.matmul %25, %27, %cst_19 {dimension_numbers = #tpu.dot_dimension_numbers<[1], [0], [0], [1], [0, 0, 1, 1], [], []>} : vector<256x4xf32>, vector<4x128xf32>, vector<256x128xf32> -> vector<256x128xf32>
    %29 = arith.addf %20, %28 : vector<256x128xf32>
    %c1_i32 = arith.constant 1 : i32
    %30 = arith.addi %1, %c1_i32 : i32
    %c0_20 = arith.constant 0 : index
    %31 = arith.index_cast %30 : i32 to index
    %c0_21 = arith.constant 0 : index
    %c0_22 = arith.constant 0 : index
    %32 = vector.load %arg2[%c0_20, %31, %c0_21, %c0_22] : memref<1x18x18x4xf32, #tpu.memory_space<vmem>>, vector<1x16x16x4xf32>
    %33 = vector.shape_cast %32 : vector<1x16x16x4xf32> to vector<16x16x4xf32>
    %34 = vector.shape_cast %33 : vector<16x16x4xf32> to vector<256x4xf32>
    %c3 = arith.constant 3 : index
    %c0_23 = arith.constant 0 : index
    %c0_24 = arith.constant 0 : index
    %35 = vector.load %arg3[%c3, %c0_23, %c0_24] : memref<9x4x128xf32, #tpu.memory_space<vmem>>, vector<1x4x128xf32>
    %36 = vector.shape_cast %35 : vector<1x4x128xf32> to vector<4x128xf32>
    %cst_25 = arith.constant dense<0.000000e+00> : vector<256x128xf32>
    %37 = tpu.matmul %34, %36, %cst_25 {dimension_numbers = #tpu.dot_dimension_numbers<[1], [0], [0], [1], [0, 0, 1, 1], [], []>} : vector<256x4xf32>, vector<4x128xf32>, vector<256x128xf32> -> vector<256x128xf32>
    %38 = arith.addf %29, %37 : vector<256x128xf32>
    %c1_i32_26 = arith.constant 1 : i32
    %39 = arith.addi %1, %c1_i32_26 : i32
    %c0_27 = arith.constant 0 : index
    %40 = arith.index_cast %39 : i32 to index
    %c1_28 = arith.constant 1 : index
    %c0_29 = arith.constant 0 : index
    %41 = vector.load %arg2[%c0_27, %40, %c1_28, %c0_29] : memref<1x18x18x4xf32, #tpu.memory_space<vmem>>, vector<1x16x16x4xf32>
    %42 = vector.shape_cast %41 : vector<1x16x16x4xf32> to vector<16x16x4xf32>
    %43 = vector.shape_cast %42 : vector<16x16x4xf32> to vector<256x4xf32>
    %c4 = arith.constant 4 : index
    %c0_30 = arith.constant 0 : index
    %c0_31 = arith.constant 0 : index
    %44 = vector.load %arg3[%c4, %c0_30, %c0_31] : memref<9x4x128xf32, #tpu.memory_space<vmem>>, vector<1x4x128xf32>
    %45 = vector.shape_cast %44 : vector<1x4x128xf32> to vector<4x128xf32>
    %cst_32 = arith.constant dense<0.000000e+00> : vector<256x128xf32>
    %46 = tpu.matmul %43, %45, %cst_32 {dimension_numbers = #tpu.dot_dimension_numbers<[1], [0], [0], [1], [0, 0, 1, 1], [], []>} : vector<256x4xf32>, vector<4x128xf32>, vector<256x128xf32> -> vector<256x128xf32>
    %47 = arith.addf %38, %46 : vector<256x128xf32>
    %c1_i32_33 = arith.constant 1 : i32
    %48 = arith.addi %1, %c1_i32_33 : i32
    %c0_34 = arith.constant 0 : index
    %49 = arith.index_cast %48 : i32 to index
    %c2_35 = arith.constant 2 : index
    %c0_36 = arith.constant 0 : index
    %50 = vector.load %arg2[%c0_34, %49, %c2_35, %c0_36] : memref<1x18x18x4xf32, #tpu.memory_space<vmem>>, vector<1x16x16x4xf32>
    %51 = vector.shape_cast %50 : vector<1x16x16x4xf32> to vector<16x16x4xf32>
    %52 = vector.shape_cast %51 : vector<16x16x4xf32> to vector<256x4xf32>
    %c5 = arith.constant 5 : index
    %c0_37 = arith.constant 0 : index
    %c0_38 = arith.constant 0 : index
    %53 = vector.load %arg3[%c5, %c0_37, %c0_38] : memref<9x4x128xf32, #tpu.memory_space<vmem>>, vector<1x4x128xf32>
    %54 = vector.shape_cast %53 : vector<1x4x128xf32> to vector<4x128xf32>
    %cst_39 = arith.constant dense<0.000000e+00> : vector<256x128xf32>
    %55 = tpu.matmul %52, %54, %cst_39 {dimension_numbers = #tpu.dot_dimension_numbers<[1], [0], [0], [1], [0, 0, 1, 1], [], []>} : vector<256x4xf32>, vector<4x128xf32>, vector<256x128xf32> -> vector<256x128xf32>
    %56 = arith.addf %47, %55 : vector<256x128xf32>
    %c2_i32 = arith.constant 2 : i32
    %57 = arith.addi %1, %c2_i32 : i32
    %c0_40 = arith.constant 0 : index
    %58 = arith.index_cast %57 : i32 to index
    %c0_41 = arith.constant 0 : index
    %c0_42 = arith.constant 0 : index
    %59 = vector.load %arg2[%c0_40, %58, %c0_41, %c0_42] : memref<1x18x18x4xf32, #tpu.memory_space<vmem>>, vector<1x16x16x4xf32>
    %60 = vector.shape_cast %59 : vector<1x16x16x4xf32> to vector<16x16x4xf32>
    %61 = vector.shape_cast %60 : vector<16x16x4xf32> to vector<256x4xf32>
    %c6 = arith.constant 6 : index
    %c0_43 = arith.constant 0 : index
    %c0_44 = arith.constant 0 : index
    %62 = vector.load %arg3[%c6, %c0_43, %c0_44] : memref<9x4x128xf32, #tpu.memory_space<vmem>>, vector<1x4x128xf32>
    %63 = vector.shape_cast %62 : vector<1x4x128xf32> to vector<4x128xf32>
    %cst_45 = arith.constant dense<0.000000e+00> : vector<256x128xf32>
    %64 = tpu.matmul %61, %63, %cst_45 {dimension_numbers = #tpu.dot_dimension_numbers<[1], [0], [0], [1], [0, 0, 1, 1], [], []>} : vector<256x4xf32>, vector<4x128xf32>, vector<256x128xf32> -> vector<256x128xf32>
    %65 = arith.addf %56, %64 : vector<256x128xf32>
    %c2_i32_46 = arith.constant 2 : i32
    %66 = arith.addi %1, %c2_i32_46 : i32
    %c0_47 = arith.constant 0 : index
    %67 = arith.index_cast %66 : i32 to index
    %c1_48 = arith.constant 1 : index
    %c0_49 = arith.constant 0 : index
    %68 = vector.load %arg2[%c0_47, %67, %c1_48, %c0_49] : memref<1x18x18x4xf32, #tpu.memory_space<vmem>>, vector<1x16x16x4xf32>
    %69 = vector.shape_cast %68 : vector<1x16x16x4xf32> to vector<16x16x4xf32>
    %70 = vector.shape_cast %69 : vector<16x16x4xf32> to vector<256x4xf32>
    %c7 = arith.constant 7 : index
    %c0_50 = arith.constant 0 : index
    %c0_51 = arith.constant 0 : index
    %71 = vector.load %arg3[%c7, %c0_50, %c0_51] : memref<9x4x128xf32, #tpu.memory_space<vmem>>, vector<1x4x128xf32>
    %72 = vector.shape_cast %71 : vector<1x4x128xf32> to vector<4x128xf32>
    %cst_52 = arith.constant dense<0.000000e+00> : vector<256x128xf32>
    %73 = tpu.matmul %70, %72, %cst_52 {dimension_numbers = #tpu.dot_dimension_numbers<[1], [0], [0], [1], [0, 0, 1, 1], [], []>} : vector<256x4xf32>, vector<4x128xf32>, vector<256x128xf32> -> vector<256x128xf32>
    %74 = arith.addf %65, %73 : vector<256x128xf32>
    %c2_i32_53 = arith.constant 2 : i32
    %75 = arith.addi %1, %c2_i32_53 : i32
    %c0_54 = arith.constant 0 : index
    %76 = arith.index_cast %75 : i32 to index
    %c2_55 = arith.constant 2 : index
    %c0_56 = arith.constant 0 : index
    %77 = vector.load %arg2[%c0_54, %76, %c2_55, %c0_56] : memref<1x18x18x4xf32, #tpu.memory_space<vmem>>, vector<1x16x16x4xf32>
    %78 = vector.shape_cast %77 : vector<1x16x16x4xf32> to vector<16x16x4xf32>
    %79 = vector.shape_cast %78 : vector<16x16x4xf32> to vector<256x4xf32>
    %c8 = arith.constant 8 : index
    %c0_57 = arith.constant 0 : index
    %c0_58 = arith.constant 0 : index
    %80 = vector.load %arg3[%c8, %c0_57, %c0_58] : memref<9x4x128xf32, #tpu.memory_space<vmem>>, vector<1x4x128xf32>
    %81 = vector.shape_cast %80 : vector<1x4x128xf32> to vector<4x128xf32>
    %cst_59 = arith.constant dense<0.000000e+00> : vector<256x128xf32>
    %82 = tpu.matmul %79, %81, %cst_59 {dimension_numbers = #tpu.dot_dimension_numbers<[1], [0], [0], [1], [0, 0, 1, 1], [], []>} : vector<256x4xf32>, vector<4x128xf32>, vector<256x128xf32> -> vector<256x128xf32>
    %83 = arith.addf %74, %82 : vector<256x128xf32>
    %c0_60 = arith.constant 0 : index
    %c0_61 = arith.constant 0 : index
    %84 = vector.load %arg4[%c0_60, %c0_61] : memref<1x128xf32, #tpu.memory_space<vmem>>, vector<1x128xf32>
    %85 = vector.broadcast %84 : vector<1x128xf32> to vector<256x128xf32>
    %86 = arith.addf %83, %85 : vector<256x128xf32>
    %87 = vector.shape_cast %86 : vector<256x128xf32> to vector<16x16x128xf32>
    %c0_62 = arith.constant 0 : index
    %c0_63 = arith.constant 0 : index
    %c0_64 = arith.constant 0 : index
    %c0_65 = arith.constant 0 : index
    %88 = vector.load %arg5[%c0_62, %c0_63, %c0_64, %c0_65] : memref<1x16x16x128xf32, #tpu.memory_space<vmem>>, vector<1x16x16x128xf32>
    %89 = vector.shape_cast %88 : vector<1x16x16x128xf32> to vector<16x16x128xf32>
    %90 = vector.shape_cast %87 : vector<16x16x128xf32> to vector<1x16x16x128xf32>
    tpu.vector_store %arg5[%c0_62, %c0_63, %c0_64, %c0_65], %90 {strides = array<i32>} : memref<1x16x16x128xf32, #tpu.memory_space<vmem>>, vector<1x16x16x128xf32>,
    return
  }
  func.func @transform_0(%arg0: i32, %arg1: i32) -> (i32, i32, i32, i32) {
    %c0_i32 = arith.constant 0 : i32
    %c0_i32_0 = arith.constant 0 : i32
    %c0_i32_1 = arith.constant 0 : i32
    %c0_i32_2 = arith.constant 0 : i32
    return %arg0, %c0_i32, %c0_i32_0, %c0_i32_1 : i32, i32, i32, i32
  }
  func.func @transform_1(%arg0: i32, %arg1: i32) -> (i32, i32, i32) {
    %c0_i32 = arith.constant 0 : i32
    %c0_i32_0 = arith.constant 0 : i32
    %c0_i32_1 = arith.constant 0 : i32
    %c0_i32_2 = arith.constant 0 : i32
    return %c0_i32, %c0_i32_0, %c0_i32_1 : i32, i32, i32
  }
  func.func @transform_2(%arg0: i32, %arg1: i32) -> (i32, i32) {
    %c0_i32 = arith.constant 0 : i32
    %c0_i32_0 = arith.constant 0 : i32
    %c0_i32_1 = arith.constant 0 : i32
    return %c0_i32, %c0_i32_0 : i32, i32
  }
  func.func @transform_3(%arg0: i32, %arg1: i32) -> (i32, i32, i32, i32) {
    %c0_i32 = arith.constant 0 : i32
    %c0_i32_0 = arith.constant 0 : i32
    %c0_i32_1 = arith.constant 0 : i32
    return %arg0, %arg1, %c0_i32, %c0_i32_0 : i32, i32, i32, i32
  }
}

</mosaic_0001>

<bundles_post_ra>
// kernel: tpu_custom_call.1
= control target key start
LH: loop header
LB: loop body
LE: loop exit
PB: predicated region body
PF: predicated region fallthrough
CT: control target
= control target key end

     0   :  { %8 = vsyncpa [#allocation3], 0  ;;  %s6831_s0 = inlined_call_operand.vmem [shape: f32[2,18,18,4], index: 0, kind: input, shape index: {}]   ;;  %s6832_s1 = inlined_call_operand.vmem [shape: f32[9,4,128], index: 1, kind: input, shape index: {}]   ;;  %s6833_s2 = inlined_call_operand.vmem [shape: f32[1,128], index: 2, kind: input, shape index: {}]   ;;  %s6834_s3 = inlined_call_operand.hbm [shape: f32[2,16,16,128], index: 3, kind: output, shape index: {}]  }
   0x1   :  { %10 = vsyncpa [#allocation3 + $0x1], 0  ;;  %s5230_s12 = smov 0   ;;  %s5232_s13 = smov 0  }
   0x2   :  { %s5234_s14 = smov 0   ;;  %s5236_s15 = smov 0  }
   0x3   :  { %s5238_s16 = smov 0   ;;  %s5240_s17 = smov 0  }
   0x4 LB: > { %s3811_s18 = sadd.s32 4294967295, %s5205_s17   ;;  %s3812_s19 = sadd.s32 4294967294, %s5205_s17   ;;  %s5205_s17 = sphi %s5240_s17, %s16_s17   ;;  %s5201_s16 = sphi %s5238_s16, %s7071_s16   ;;  %s5197_s15 = sphi %s5236_s15, %s7070_s15   ;;  %s5193_s14 = sphi %s5234_s14, %s7069_s14   ;;  %s5189_s13 = sphi %s5232_s13, %s7068_s13   ;;  %s5185_s12 = sphi %s5230_s12, %s7067_s12  }
   0x5   : > { %s28_s20 = sadd.s32 1, %s5201_s16  ;;  %s105_s21 = sadd.s32 1, %s5193_s14 }
   0x6   : > { %p30_p0 = scmp.ge.s32.totalorder %s28_s20, 2  ;;  %p115_p1 = scmp.ne.s32.totalorder %s5193_s14, %s5189_s13 }
   0x7   : > { %p116_p2 = scmp.eq.s32.totalorder %s3811_s18, 1  ;;  %p121_p3 = scmp.ne.s32.totalorder %s5189_s13, %s5185_s12 }
   0x8   : > { %s7073_s20 = smov (%p30_p0, %s28_s20), 0  ;;  %p122_p5 = scmp.eq.s32.totalorder %s3812_s19, 1 }
   0x9   : > { %p5270_p4 = por %p116_p2, %p115_p1  ;;  %s100_s23 = ssub.s32 %s5201_s16, %s7073_s20 }
   0xa   : > { %p3815_p6 = scmp.ge.s32.totalorder %s5205_s17, 1  ;;  %p103_p7 = scmp.eq.s32.totalorder %s100_s23, 0 }
   0xb   : > { %p5277_p8 = por %p122_p5, %p121_p3  ;;  %p154_p9 = scmp.lt.s32.totalorder %s5205_s17, 3 }
   0xc   : > { %s5283_s25 = scalar_select %p103_p7, %s5193_s14, %s105_s21  }
   0xd   : > { %p155_p10 = pnand %p3815_p6, %p154_p9 }
   0xf   : > { %158 = sbr.rel (%p155_p10) target bundleno = 529 (0x211), region = 32 }
  0x14   : > { %v3818_v0 = vld [vmem:[%s6832_s1 + $0x4] sm:$0xf]  ;;  %vm351_vm0 = vcmask 1043456   ;;  %p178_p11 = scmp.lt.s32.totalorder %s5197_s15, 1  ;;  %v219_v1 = vld [vmem:[%s6832_s1] sm:$0xf] }
  0x15   : > { %5069 = vmatprep.subr.msk.mxu1 %vm351_vm0, %v3818_v0  ;;  %4619 = vmatprep.subr.msk.mxu0 %vm351_vm0, %v3818_v0  ;;  %v3885_v2 = vld [vmem:[%s6832_s1 + $0x8] sm:$0xf]  ;;  %vm254_vm1 = vcmask 31744   ;;  %v5330_v9 = vld [vmem:[%s6832_s1 + $0xc] sm:$0xf]  ;;  %s4321_s10 = sshll.u32 %s5197_s15, 12 }
  0x16   : > { %5070 = vmatpush3.msk.msra.mxu1 %vm351_vm0, %v3818_v0  ;;  %4620 = vmatpush3.msk.msra.mxu0 %vm351_vm0, %v3818_v0  ;;  %s179_s5 = scalar_select %p178_p11, %s5197_s15, 1  ;;  %v5335_v10 = vld [vmem:[%s6832_s1 + $0x10] sm:$0xf]  ;;  %v5494_v43 = vld [vmem:[%s6832_s1 + $0x14] sm:$0xf] }
  0x17   : > { %4669 = vmatprep.subr.msk.mxu1 %vm351_vm0, %v219_v1  ;;  %4719 = vmatprep.subr.msk.mxu0 %vm351_vm0, %v3885_v2  ;;  %v5499_v44 = vld [vmem:[%s6832_s1 + $0x18] sm:$0xf]  ;;  %s6777_s21 = scalar_lea.hbm %s6834_s3, %s4321_s10  ;;  %s5207_s26 = smov [#allocation2]  }
  0x18   : > { %s5071_s6 = smul.u32 432, %s179_s5  ;;  %s175_s5 = sand.u32 1, %s5189_s13  }
  0x19   : > { %s6786_s15 = scalar_lea.sflag [#allocation3], %s175_s5  ;;  %s5133_s27 = sshll.u32 %s5207_s26, 4  ;;  %s5134_s27 = int_to_ptr.vmem [resolvable:$false] %s5133_s27 }
  0x1a   : > { %s5305_s9 = scalar_lea.vmem %s6831_s0, %s5071_s6  ;;  %s3816_s6 = sshll.u32 %s175_s5, 8 }
  0x1b   : > { %v220_v3 = vld [vmem:[%s5305_s9 + $0x1] sm:$0xff]  ;;  %v221_v5 = vld [vmem:[%s5305_s9 + $0x9] sm:$0xff]  ;;  %v5319_v7 = vld [vmem:[%s5305_s9 + $0x19] sm:$0xff]  ;;  %s5135_s28 = scalar_lea.vmem %s5134_s27, 8192 }
  0x1c   : > { %v5309_v4 = vld [vmem:[%s5305_s9 + $0xc1] sm:$0xff]  ;;  %4621 = vmatprep.mubr.msk.f32.mxu0 %vm254_vm1, %v220_v3  ;;  %v5316_v6 = vld [vmem:[%s5305_s9 + $0xc9] sm:$0xff]  ;;  %v5322_v8 = vld [vmem:[%s5305_s9 + $0xd9] sm:$0xff] }
  0x1d   : > { %4645 = vmatprep.mubr.msk.f32.mxu1 %vm254_vm1, %v5309_v4  ;;  %4622 = vmatmul.mubr.msk.f32.vlgmr.msra.gmra.mxu0 %vm254_vm1, %v221_v5  ;;  %v5340_v11 = vld [vmem:[%s5305_s9 + $0x21] sm:$0xff]  ;;  %v5350_v13 = vld [vmem:[%s5305_s9 + $0x31] sm:$0xff]  ;;  %v5368_v15 = vld [vmem:[%s5305_s9 + $0x39] sm:$0xff] }
  0x1e   : > { %4646 = vmatmul.mubr.msk.f32.vlgmr.msra.gmra.mxu1 %vm254_vm1, %v5316_v6  ;;  %4720 = vmatpush3.msk.msra.mxu0 %vm351_vm0, %v3885_v2  ;;  %v5343_v12 = vld [vmem:[%s5305_s9 + $0xe1] sm:$0xff]  ;;  %v5353_v14 = vld [vmem:[%s5305_s9 + $0xf1] sm:$0xff]  ;;  %v5371_v16 = vld [vmem:[%s5305_s9 + $0xf9] sm:$0xff] }
  0x1f   : > { %4670 = vmatpush3.msk.msra.mxu1 %vm351_vm0, %v219_v1  ;;  %4624 = vmatprep.mubr.msk.f32.mxu0 %vm254_vm1, %v5319_v7  ;;  %v5374_v17 = vld [vmem:[%s5305_s9 + $0x49] sm:$0xff]  ;;  %v5388_v19 = vld [vmem:[%s5305_s9 + $0x51] sm:$0xff]  ;;  %v5394_v21 = vld [vmem:[%s5305_s9 + $0x61] sm:$0xff] }
  0x20   : > { %4648 = vmatprep.mubr.msk.f32.mxu1 %vm254_vm1, %v5322_v8  ;;  %4769 = vmatprep.subr.msk.mxu1 %vm351_vm0, %v5330_v9  ;;  %v5377_v18 = vld [vmem:[%s5305_s9 + $0x109] sm:$0xff]  ;;  %v5391_v20 = vld [vmem:[%s5305_s9 + $0x111] sm:$0xff]  ;;  %v5397_v22 = vld [vmem:[%s5305_s9 + $0x121] sm:$0xff] }
  0x21   : > { %4819 = vmatprep.subr.msk.mxu0 %vm351_vm0, %v5335_v10  ;;  %4625 = vmatmul.mubr.msk.f32.gmra.mxu0 %vm254_vm1, %v5340_v11  ;;  %v5408_v23 = vld [vmem:[%s5305_s9 + $0x69] sm:$0xff]  ;;  %v5414_v25 = vld [vmem:[%s5305_s9 + $0x79] sm:$0xff]  ;;  %v5428_v27 = vld [vmem:[%s5305_s9 + $0x81] sm:$0xff] }
  0x22   : > { %4649 = vmatmul.mubr.msk.f32.gmra.mxu1 %vm254_vm1, %v5343_v12  ;;  %4627 = vmatprep.mubr.msk.f32.mxu0 %vm254_vm1, %v5350_v13  ;;  %v5411_v24 = vld [vmem:[%s5305_s9 + $0x129] sm:$0xff]  ;;  %v5417_v26 = vld [vmem:[%s5305_s9 + $0x139] sm:$0xff]  ;;  %v5431_v28 = vld [vmem:[%s5305_s9 + $0x141] sm:$0xff] }
  0x23   : > { %4651 = vmatprep.mubr.msk.f32.mxu1 %vm254_vm1, %v5353_v14  ;;  %v5434_v29 = vld [vmem:[%s5305_s9 + $0x91] sm:$0xff]  ;;  %v5448_v31 = vld [vmem:[%s5305_s9 + $0x99] sm:$0xff]  ;;  %v5454_v33 = vld [vmem:[%s5305_s9 + $0xa9] sm:$0xff] }
  0x24   : > { %v5437_v30 = vld [vmem:[%s5305_s9 + $0x151] sm:$0xff]  ;;  %v5451_v32 = vld [vmem:[%s5305_s9 + $0x159] sm:$0xff]  ;;  %v5457_v34 = vld [vmem:[%s5305_s9 + $0x169] sm:$0xff] }
  0x25   : > { %4628 = vmatmul.mubr.msk.f32.gmra.mxu0 %vm254_vm1, %v5368_v15  ;;  %v5468_v35 = vld [vmem:[%s5305_s9 + $0xb1] sm:$0xff]  ;;  %v187_v37 = vld [vmem:[%s5305_s9] sm:$0xff]  ;;  %v188_v39 = vld [vmem:[%s5305_s9 + $0x8] sm:$0xff] }
  0x26   : > { %4652 = vmatmul.mubr.msk.f32.gmra.mxu1 %vm254_vm1, %v5371_v16  ;;  %4630 = vmatprep.mubr.msk.f32.mxu0 %vm254_vm1, %v5374_v17  ;;  %v5471_v36 = vld [vmem:[%s5305_s9 + $0x171] sm:$0xff]  ;;  %v904_v38 = vld [vmem:[%s5305_s9 + $0x2] sm:$0xff]  ;;  %v5487_v42 = vld [vmem:[%s5305_s9 + $0x1a] sm:$0xff] }
  0x27   : > { %4654 = vmatprep.mubr.msk.f32.mxu1 %vm254_vm1, %v5377_v18  ;;  %6897 = vst [vmem:[#allocation5_spill] sm:$0xff] %v5471_v36  ;;  %v905_v40 = vld [vmem:[%s5305_s9 + $0xa] sm:$0xff]  ;;  %v5484_v41 = vld [vmem:[%s5305_s9 + $0x18] sm:$0xff]  ;;  %6898 = vst [vmem:[#allocation6_spill] sm:$0xff] %v5487_v42 }
  0x28   : > { %v5506_v45 = vld [vmem:[%s5305_s9 + $0x20] sm:$0xff]  ;;  %v5516_v47 = vld [vmem:[%s5305_s9 + $0x30] sm:$0xff]  ;;  %v5534_v49 = vld [vmem:[%s5305_s9 + $0x38] sm:$0xff] }
  0x29   : > { %4631 = vmatmul.mubr.msk.f32.gmra.mxu0 %vm254_vm1, %v5388_v19  ;;  %v5509_v46 = vld [vmem:[%s5305_s9 + $0x22] sm:$0xff]  ;;  %v5519_v48 = vld [vmem:[%s5305_s9 + $0x32] sm:$0xff]  ;;  %v5537_v50 = vld [vmem:[%s5305_s9 + $0x3a] sm:$0xff] }
  0x2a   : > { %4655 = vmatmul.mubr.msk.f32.gmra.mxu1 %vm254_vm1, %v5391_v20  ;;  %4633 = vmatprep.mubr.msk.f32.mxu0 %vm254_vm1, %v5394_v21  ;;  %6899 = vst [vmem:[#allocation7_spill] sm:$0xff] %v5509_v46  ;;  %6900 = vst [vmem:[#allocation8_spill] sm:$0xff] %v5519_v48  ;;  %v5540_v51 = vld [vmem:[%s5305_s9 + $0x48] sm:$0xff]  ;;  %v5554_v53 = vld [vmem:[%s5305_s9 + $0x50] sm:$0xff] }
  0x2b   : > { %4657 = vmatprep.mubr.msk.f32.mxu1 %vm254_vm1, %v5397_v22  ;;  %6901 = vst [vmem:[#allocation9_spill] sm:$0xff] %v5537_v50  ;;  %v5543_v52 = vld [vmem:[%s5305_s9 + $0x4a] sm:$0xff]  ;;  %v5557_v54 = vld [vmem:[%s5305_s9 + $0x52] sm:$0xff]  ;;  %v5560_v55 = vld [vmem:[%s5305_s9 + $0x60] sm:$0xff] }
  0x2c   : > { %6902 = vst [vmem:[#allocation10_spill] sm:$0xff] %v5543_v52  ;;  %6903 = vst [vmem:[#allocation11_spill] sm:$0xff] %v5557_v54  ;;  %v5563_v56 = vld [vmem:[%s5305_s9 + $0x62] sm:$0xff]  ;;  %v5577_v58 = vld [vmem:[%s5305_s9 + $0x6a] sm:$0xff] }
  0x2d   : > { %4634 = vmatmul.mubr.msk.f32.gmra.mxu0 %vm254_vm1, %v5408_v23  ;;  %6904 = vst [vmem:[#allocation12_spill] sm:$0xff] %v5563_v56  ;;  %v5574_v57 = vld [vmem:[%s5305_s9 + $0x68] sm:$0xff]  ;;  %6905 = vst [vmem:[#allocation13_spill] sm:$0xff] %v5577_v58  ;;  %v5580_v59 = vld [vmem:[%s5305_s9 + $0x78] sm:$0xff] }
  0x2e   : > { %4658 = vmatmul.mubr.msk.f32.gmra.mxu1 %vm254_vm1, %v5411_v24  ;;  %4636 = vmatprep.mubr.msk.f32.mxu0 %vm254_vm1, %v5414_v25  ;;  %v5583_v60 = vld [vmem:[%s5305_s9 + $0x7a] sm:$0xff]  ;;  %v5597_v62 = vld [vmem:[%s5305_s9 + $0x82] sm:$0xff]  ;;  %v5600_v63 = vld [vmem:[%s5305_s9 + $0x90] sm:$0xff] }
  0x2f   : > { %4660 = vmatprep.mubr.msk.f32.mxu1 %vm254_vm1, %v5417_v26  ;;  %6906 = vst [vmem:[#allocation14_spill] sm:$0xff] %v5583_v60  ;;  %v5594_v61 = vld [vmem:[%s5305_s9 + $0x80] sm:$0xff]  ;;  %6907 = vst [vmem:[#allocation15_spill] sm:$0xff] %v5597_v62  ;;  %v5603_v0 = vld [vmem:[%s5305_s9 + $0x92] sm:$0xff] }
  0x30   : > { %6908 = vst [vmem:[#allocation16_spill] sm:$0xff] %v5603_v0  ;;  %v5614_v1 = vld [vmem:[%s5305_s9 + $0x98] sm:$0xff]  ;;  %v5620_v3 = vld [vmem:[%s5305_s9 + $0xa8] sm:$0xff] }
  0x31   : > { %4637 = vmatmul.mubr.msk.f32.gmra.mxu0 %vm254_vm1, %v5428_v27  ;;  %v5617_v2 = vld [vmem:[%s5305_s9 + $0x9a] sm:$0xff]  ;;  %v5623_v5 = vld [vmem:[%s5305_s9 + $0xaa] sm:$0xff] }
  0x32   : > { %4661 = vmatmul.mubr.msk.f32.gmra.mxu1 %vm254_vm1, %v5431_v28  ;;  %4639 = vmatprep.mubr.msk.f32.mxu0 %vm254_vm1, %v5434_v29  ;;  %6909 = vst [vmem:[#allocation17_spill] sm:$0xff] %v5617_v2  ;;  %6910 = vst [vmem:[#allocation18_spill] sm:$0xff] %v5623_v5 }
  0x33   : > { %4663 = vmatprep.mubr.msk.f32.mxu1 %vm254_vm1, %v5437_v30 }
  0x35   : > { %4640 = vmatmul.mubr.msk.f32.gmra.mxu0 %vm254_vm1, %v5448_v31 }
  0x36   : > { %4664 = vmatmul.mubr.msk.f32.gmra.mxu1 %vm254_vm1, %v5451_v32  ;;  %4642 = vmatprep.mubr.msk.f32.mxu0 %vm254_vm1, %v5454_v33 }
  0x37   : > { %4666 = vmatprep.mubr.msk.f32.mxu1 %vm254_vm1, %v5457_v34 }
  0x39   : > { %4643 = vmatmul.mubr.msk.f32.gmra.mxu0 %vm254_vm1, %v5468_v35 }
  0x3a   : > { %4667 = vmatmul.mubr.msk.f32.gmra.mxu1 %vm254_vm1, %v5471_v36  ;;  %4721 = vmatprep.mubr.msk.f32.mxu0 %vm254_vm1, %v904_v38  ;;  %v5643_v38 = vld [vmem:[%s5305_s9 + $0xc2] sm:$0xff]  ;;  %v5783_v36 = vld [vmem:[%s5305_s9 + $0x16a] sm:$0xff] }
  0x3b   : > { %4671 = vmatprep.mubr.msk.f32.mxu1 %vm254_vm1, %v187_v37  ;;  %v5640_v37 = vld [vmem:[%s5305_s9 + $0xc0] sm:$0xff]  ;;  %6912 = vst [vmem:[#allocation20_spill] sm:$0xff] %v5643_v38  ;;  %6926 = vst [vmem:[#allocation34_spill] sm:$0xff] %v5783_v36 }
  0x3d   : > { %4722 = vmatmul.mubr.msk.f32.vlgmr.msra.gmra.mxu0 %vm254_vm1, %v905_v40  ;;  %v5657_v40 = vld [vmem:[%s5305_s9 + $0xca] sm:$0xff] }
  0x3e   : > { %4672 = vmatmul.mubr.msk.f32.vlgmr.msra.gmra.mxu1 %vm254_vm1, %v188_v39  ;;  %4820 = vmatpush3.msk.msra.mxu0 %vm351_vm0, %v5335_v10  ;;  %v5637_v10 = vld [vmem:[%s5305_s9 + $0xb2] sm:$0xff]  ;;  %v5654_v39 = vld [vmem:[%s5305_s9 + $0xc8] sm:$0xff]  ;;  %6913 = vst [vmem:[#allocation21_spill] sm:$0xff] %v5657_v40 }
  0x3f   : > { %4770 = vmatpush3.msk.msra.mxu1 %vm351_vm0, %v5330_v9  ;;  %4674 = vmatprep.mubr.msk.f32.mxu1 %vm254_vm1, %v5484_v41  ;;  %v5634_v9 = vld [vmem:[%s5305_s9 + $0xb0] sm:$0xff]  ;;  %6911 = vst [vmem:[#allocation19_spill] sm:$0xff] %v5637_v10 }
  0x40   : > { %4724 = vmatprep.mubr.msk.f32.mxu0 %vm254_vm1, %v5487_v42  ;;  %4869 = vmatprep.subr.msk.mxu1 %vm351_vm0, %v5494_v43  ;;  %v5780_v42 = vld [vmem:[%s5305_s9 + $0x168] sm:$0xff] }
  0x41   : > { %4919 = vmatprep.subr.msk.mxu0 %vm351_vm0, %v5499_v44  ;;  %4725 = vmatmul.mubr.msk.f32.gmra.mxu0 %vm254_vm1, %v5509_v46  ;;  %v5763_v46 = vld [vmem:[%s5305_s9 + $0x152] sm:$0xff] }
  0x42   : > { %4675 = vmatmul.mubr.msk.f32.gmra.mxu1 %vm254_vm1, %v5506_v45  ;;  %4727 = vmatprep.mubr.msk.f32.mxu0 %vm254_vm1, %v5519_v48  ;;  %v5760_v48 = vld [vmem:[%s5305_s9 + $0x150] sm:$0xff]  ;;  %6924 = vst [vmem:[#allocation32_spill] sm:$0xff] %v5763_v46 }
  0x43   : > { %4677 = vmatprep.mubr.msk.f32.mxu1 %vm254_vm1, %v5516_v47 }
  0x45   : > { %4728 = vmatmul.mubr.msk.f32.gmra.mxu0 %vm254_vm1, %v5537_v50  ;;  %v5743_v50 = vld [vmem:[%s5305_s9 + $0x13a] sm:$0xff] }
  0x46   : > { %4678 = vmatmul.mubr.msk.f32.gmra.mxu1 %vm254_vm1, %v5534_v49  ;;  %4730 = vmatprep.mubr.msk.f32.mxu0 %vm254_vm1, %v5543_v52  ;;  %v5740_v52 = vld [vmem:[%s5305_s9 + $0x138] sm:$0xff]  ;;  %6922 = vst [vmem:[#allocation30_spill] sm:$0xff] %v5743_v50 }
  0x47   : > { %4680 = vmatprep.mubr.msk.f32.mxu1 %vm254_vm1, %v5540_v51 }
  0x49   : > { %4731 = vmatmul.mubr.msk.f32.gmra.mxu0 %vm254_vm1, %v5557_v54  ;;  %v5723_v54 = vld [vmem:[%s5305_s9 + $0x122] sm:$0xff] }
  0x4a   : > { %4681 = vmatmul.mubr.msk.f32.gmra.mxu1 %vm254_vm1, %v5554_v53  ;;  %4733 = vmatprep.mubr.msk.f32.mxu0 %vm254_vm1, %v5563_v56  ;;  %v5720_v56 = vld [vmem:[%s5305_s9 + $0x120] sm:$0xff]  ;;  %6920 = vst [vmem:[#allocation28_spill] sm:$0xff] %v5723_v54 }
  0x4b   : > { %4683 = vmatprep.mubr.msk.f32.mxu1 %vm254_vm1, %v5560_v55 }
  0x4d   : > { %4734 = vmatmul.mubr.msk.f32.gmra.mxu0 %vm254_vm1, %v5577_v58  ;;  %v5703_v58 = vld [vmem:[%s5305_s9 + $0x10a] sm:$0xff] }
  0x4e   : > { %4684 = vmatmul.mubr.msk.f32.gmra.mxu1 %vm254_vm1, %v5574_v57  ;;  %4736 = vmatprep.mubr.msk.f32.mxu0 %vm254_vm1, %v5583_v60  ;;  %v5700_v60 = vld [vmem:[%s5305_s9 + $0x108] sm:$0xff]  ;;  %6918 = vst [vmem:[#allocation26_spill] sm:$0xff] %v5703_v58 }
  0x4f   : > { %4686 = vmatprep.mubr.msk.f32.mxu1 %vm254_vm1, %v5580_v59 }
  0x51   : > { %4737 = vmatmul.mubr.msk.f32.gmra.mxu0 %vm254_vm1, %v5597_v62  ;;  %v5683_v62 = vld [vmem:[%s5305_s9 + $0xf2] sm:$0xff] }
  0x52   : > { %4687 = vmatmul.mubr.msk.f32.gmra.mxu1 %vm254_vm1, %v5594_v61  ;;  %4739 = vmatprep.mubr.msk.f32.mxu0 %vm254_vm1, %v5603_v0  ;;  %v5680_v0 = vld [vmem:[%s5305_s9 + $0xf0] sm:$0xff]  ;;  %6916 = vst [vmem:[#allocation24_spill] sm:$0xff] %v5683_v62 }
  0x53   : > { %4689 = vmatprep.mubr.msk.f32.mxu1 %vm254_vm1, %v5600_v63 }
  0x55   : > { %4740 = vmatmul.mubr.msk.f32.gmra.mxu0 %vm254_vm1, %v5617_v2  ;;  %v5663_v2 = vld [vmem:[%s5305_s9 + $0xda] sm:$0xff] }
  0x56   : > { %4690 = vmatmul.mubr.msk.f32.gmra.mxu1 %vm254_vm1, %v5614_v1  ;;  %4742 = vmatprep.mubr.msk.f32.mxu0 %vm254_vm1, %v5623_v5  ;;  %v5660_v5 = vld [vmem:[%s5305_s9 + $0xd8] sm:$0xff]  ;;  %6914 = vst [vmem:[#allocation22_spill] sm:$0xff] %v5663_v2 }
  0x57   : > { %4692 = vmatprep.mubr.msk.f32.mxu1 %vm254_vm1, %v5620_v3 }
  0x59   : > { %4743 = vmatmul.mubr.msk.f32.gmra.mxu0 %vm254_vm1, %v5637_v10  ;;  %v5677_v10 = vld [vmem:[%s5305_s9 + $0xe2] sm:$0xff] }
  0x5a   : > { %4693 = vmatmul.mubr.msk.f32.gmra.mxu1 %vm254_vm1, %v5634_v9  ;;  %4745 = vmatprep.mubr.msk.f32.mxu0 %vm254_vm1, %v5643_v38  ;;  %v5674_v38 = vld [vmem:[%s5305_s9 + $0xe0] sm:$0xff]  ;;  %6915 = vst [vmem:[#allocation23_spill] sm:$0xff] %v5677_v10 }
  0x5b   : > { %4695 = vmatprep.mubr.msk.f32.mxu1 %vm254_vm1, %v5640_v37 }
  0x5d   : > { %4746 = vmatmul.mubr.msk.f32.gmra.mxu0 %vm254_vm1, %v5657_v40  ;;  %v5697_v40 = vld [vmem:[%s5305_s9 + $0xfa] sm:$0xff] }
  0x5e   : > { %4696 = vmatmul.mubr.msk.f32.gmra.mxu1 %vm254_vm1, %v5654_v39  ;;  %4748 = vmatprep.mubr.msk.f32.mxu0 %vm254_vm1, %v5663_v2  ;;  %v5694_v2 = vld [vmem:[%s5305_s9 + $0xf8] sm:$0xff]  ;;  %6917 = vst [vmem:[#allocation25_spill] sm:$0xff] %v5697_v40 }
  0x5f   : > { %4698 = vmatprep.mubr.msk.f32.mxu1 %vm254_vm1, %v5660_v5 }
  0x61   : > { %4749 = vmatmul.mubr.msk.f32.gmra.mxu0 %vm254_vm1, %v5677_v10  ;;  %v5717_v10 = vld [vmem:[%s5305_s9 + $0x112] sm:$0xff] }
  0x62   : > { %4699 = vmatmul.mubr.msk.f32.gmra.mxu1 %vm254_vm1, %v5674_v38  ;;  %4751 = vmatprep.mubr.msk.f32.mxu0 %vm254_vm1, %v5683_v62  ;;  %v5714_v62 = vld [vmem:[%s5305_s9 + $0x110] sm:$0xff]  ;;  %6919 = vst [vmem:[#allocation27_spill] sm:$0xff] %v5717_v10 }
  0x63   : > { %4701 = vmatprep.mubr.msk.f32.mxu1 %vm254_vm1, %v5680_v0 }
  0x65   : > { %4752 = vmatmul.mubr.msk.f32.gmra.mxu0 %vm254_vm1, %v5697_v40  ;;  %v5737_v40 = vld [vmem:[%s5305_s9 + $0x12a] sm:$0xff] }
  0x66   : > { %4702 = vmatmul.mubr.msk.f32.gmra.mxu1 %vm254_vm1, %v5694_v2  ;;  %4754 = vmatprep.mubr.msk.f32.mxu0 %vm254_vm1, %v5703_v58  ;;  %v5734_v58 = vld [vmem:[%s5305_s9 + $0x128] sm:$0xff]  ;;  %6921 = vst [vmem:[#allocation29_spill] sm:$0xff] %v5737_v40 }
  0x67   : > { %4704 = vmatprep.mubr.msk.f32.mxu1 %vm254_vm1, %v5700_v60 }
  0x69   : > { %4755 = vmatmul.mubr.msk.f32.gmra.mxu0 %vm254_vm1, %v5717_v10  ;;  %v5757_v10 = vld [vmem:[%s5305_s9 + $0x142] sm:$0xff] }
  0x6a   : > { %4705 = vmatmul.mubr.msk.f32.gmra.mxu1 %vm254_vm1, %v5714_v62  ;;  %4757 = vmatprep.mubr.msk.f32.mxu0 %vm254_vm1, %v5723_v54  ;;  %v5754_v54 = vld [vmem:[%s5305_s9 + $0x140] sm:$0xff]  ;;  %6923 = vst [vmem:[#allocation31_spill] sm:$0xff] %v5757_v10 }
  0x6b   : > { %4707 = vmatprep.mubr.msk.f32.mxu1 %vm254_vm1, %v5720_v56 }
  0x6d   : > { %4758 = vmatmul.mubr.msk.f32.gmra.mxu0 %vm254_vm1, %v5737_v40  ;;  %v5777_v40 = vld [vmem:[%s5305_s9 + $0x15a] sm:$0xff] }
  0x6e   : > { %4708 = vmatmul.mubr.msk.f32.gmra.mxu1 %vm254_vm1, %v5734_v58  ;;  %4760 = vmatprep.mubr.msk.f32.mxu0 %vm254_vm1, %v5743_v50  ;;  %v5774_v50 = vld [vmem:[%s5305_s9 + $0x158] sm:$0xff]  ;;  %6925 = vst [vmem:[#allocation33_spill] sm:$0xff] %v5777_v40 }
  0x6f   : > { %4710 = vmatprep.mubr.msk.f32.mxu1 %vm254_vm1, %v5740_v52 }
  0x71   : > { %4761 = vmatmul.mubr.msk.f32.gmra.mxu0 %vm254_vm1, %v5757_v10  ;;  %v5797_v10 = vld [vmem:[%s5305_s9 + $0x172] sm:$0xff] }
  0x72   : > { %4711 = vmatmul.mubr.msk.f32.gmra.mxu1 %vm254_vm1, %v5754_v54  ;;  %4763 = vmatprep.mubr.msk.f32.mxu0 %vm254_vm1, %v5763_v46  ;;  %v5794_v46 = vld [vmem:[%s5305_s9 + $0x170] sm:$0xff]  ;;  %6927 = vst [vmem:[#allocation35_spill] sm:$0xff] %v5797_v10 }
  0x73   : > { %4713 = vmatprep.mubr.msk.f32.mxu1 %vm254_vm1, %v5760_v48 }
  0x75   : > { %4764 = vmatmul.mubr.msk.f32.gmra.mxu0 %vm254_vm1, %v5777_v40 }
  0x76   : > { %4714 = vmatmul.mubr.msk.f32.gmra.mxu1 %vm254_vm1, %v5774_v50  ;;  %4766 = vmatprep.mubr.msk.f32.mxu0 %vm254_vm1, %v5783_v36  ;;  %v5814_v36 = vld [vmem:[%s6832_s1 + $0x1c] sm:$0xf] }
  0x77   : > { %4716 = vmatprep.mubr.msk.f32.mxu1 %vm254_vm1, %v5780_v42 }
  0x79   : > { %4767 = vmatmul.mubr.msk.f32.gmra.mxu0 %vm254_vm1, %v5797_v10  ;;  %v5819_v10 = vld [vmem:[%s6832_s1 + $0x20] sm:$0xf] }
  0x7a   : > { %4717 = vmatmul.mubr.msk.f32.gmra.mxu1 %vm254_vm1, %v5794_v46  ;;  %4821 = vmatprep.mubr.msk.f32.mxu0 %vm254_vm1, %v5319_v7  ;;  %v6929_v7 = vld [vmem:[#allocation5_spill] sm:$0xff] }
  0x7b   : > { %4771 = vmatprep.mubr.msk.f32.mxu1 %vm254_vm1, %v5484_v41 }
  0x7d   : > { %4822 = vmatmul.mubr.msk.f32.vlgmr.msra.gmra.mxu0 %vm254_vm1, %v5340_v11  ;;  %v5955_v11 = vld [vmem:[%s5305_s9 + $0x189] sm:$0xff] }
  0x7e   : > { %4772 = vmatmul.mubr.msk.f32.vlgmr.msra.gmra.mxu1 %vm254_vm1, %v5506_v45  ;;  %4920 = vmatpush3.msk.msra.mxu0 %vm351_vm0, %v5499_v44  ;;  %6930 = vst [vmem:[#allocation5_spill] sm:$0xff] %v5955_v11  ;;  %v6948_v44 = vld [vmem:[#allocation23_spill] sm:$0xff]  ;;  %v6949_v45 = vld [vmem:[#allocation24_spill] sm:$0xff] }
  0x7f   : > { %4870 = vmatpush3.msk.msra.mxu1 %vm351_vm0, %v5494_v43  ;;  %4774 = vmatprep.mubr.msk.f32.mxu1 %vm254_vm1, %v5516_v47 }
  0x80   : > { %4824 = vmatprep.mubr.msk.f32.mxu0 %vm254_vm1, %v5350_v13  ;;  %4969 = vmatprep.subr.msk.mxu1 %vm351_vm0, %v5814_v36 }
  0x81   : > { %5019 = vmatprep.subr.msk.mxu0 %vm351_vm0, %v5819_v10  ;;  %4825 = vmatmul.mubr.msk.f32.gmra.mxu0 %vm254_vm1, %v5368_v15 }
  0x82   : > { %4775 = vmatmul.mubr.msk.f32.gmra.mxu1 %vm254_vm1, %v5534_v49  ;;  %4827 = vmatprep.mubr.msk.f32.mxu0 %vm254_vm1, %v5374_v17 }
  0x83   : > { %4777 = vmatprep.mubr.msk.f32.mxu1 %vm254_vm1, %v5540_v51 }
  0x85   : > { %4828 = vmatmul.mubr.msk.f32.gmra.mxu0 %vm254_vm1, %v5388_v19 }
  0x86   : > { %4778 = vmatmul.mubr.msk.f32.gmra.mxu1 %vm254_vm1, %v5554_v53  ;;  %4830 = vmatprep.mubr.msk.f32.mxu0 %vm254_vm1, %v5394_v21 }
  0x87   : > { %4780 = vmatprep.mubr.msk.f32.mxu1 %vm254_vm1, %v5560_v55 }
  0x89   : > { %4831 = vmatmul.mubr.msk.f32.gmra.mxu0 %vm254_vm1, %v5408_v23 }
  0x8a   : > { %4781 = vmatmul.mubr.msk.f32.gmra.mxu1 %vm254_vm1, %v5574_v57  ;;  %4833 = vmatprep.mubr.msk.f32.mxu0 %vm254_vm1, %v5414_v25 }
  0x8b   : > { %4783 = vmatprep.mubr.msk.f32.mxu1 %vm254_vm1, %v5580_v59 }
  0x8d   : > { %4834 = vmatmul.mubr.msk.f32.gmra.mxu0 %vm254_vm1, %v5428_v27 }
  0x8e   : > { %4784 = vmatmul.mubr.msk.f32.gmra.mxu1 %vm254_vm1, %v5594_v61  ;;  %4836 = vmatprep.mubr.msk.f32.mxu0 %vm254_vm1, %v5434_v29  ;;  %v6940_v29 = vld [vmem:[#allocation15_spill] sm:$0xff] }
  0x8f   : > { %4786 = vmatprep.mubr.msk.f32.mxu1 %vm254_vm1, %v5600_v63 }
  0x91   : > { %4837 = vmatmul.mubr.msk.f32.gmra.mxu0 %vm254_vm1, %v5448_v31  ;;  %v6942_v31 = vld [vmem:[#allocation17_spill] sm:$0xff] }
  0x92   : > { %4787 = vmatmul.mubr.msk.f32.gmra.mxu1 %vm254_vm1, %v5614_v1  ;;  %4839 = vmatprep.mubr.msk.f32.mxu0 %vm254_vm1, %v5454_v33  ;;  %v6944_v33 = vld [vmem:[#allocation19_spill] sm:$0xff] }
  0x93   : > { %4789 = vmatprep.mubr.msk.f32.mxu1 %vm254_vm1, %v5620_v3 }
  0x95   : > { %4840 = vmatmul.mubr.msk.f32.gmra.mxu0 %vm254_vm1, %v5468_v35  ;;  %v6946_v35 = vld [vmem:[#allocation21_spill] sm:$0xff] }
  0x96   : > { %4790 = vmatmul.mubr.msk.f32.gmra.mxu1 %vm254_vm1, %v5634_v9  ;;  %4842 = vmatprep.mubr.msk.f32.mxu0 %vm254_vm1, %v5309_v4  ;;  %v5938_v4 = vld [vmem:[%s5305_s9 + $0x180] sm:$0xff] }
  0x97   : > { %4792 = vmatprep.mubr.msk.f32.mxu1 %vm254_vm1, %v5640_v37 }
  0x99   : > { %4843 = vmatmul.mubr.msk.f32.gmra.mxu0 %vm254_vm1, %v5316_v6  ;;  %v5941_v6 = vld [vmem:[%s5305_s9 + $0x181] sm:$0xff] }
  0x9a   : > { %4793 = vmatmul.mubr.msk.f32.gmra.mxu1 %vm254_vm1, %v5654_v39  ;;  %4845 = vmatprep.mubr.msk.f32.mxu0 %vm254_vm1, %v5322_v8  ;;  %6928 = vst [vmem:[#allocation36_spill] sm:$0xff] %v5941_v6  ;;  %v5952_v8 = vld [vmem:[%s5305_s9 + $0x188] sm:$0xff] }
  0x9b   : > { %4795 = vmatprep.mubr.msk.f32.mxu1 %vm254_vm1, %v5660_v5 }
  0x9d   : > { %4846 = vmatmul.mubr.msk.f32.gmra.mxu0 %vm254_vm1, %v5343_v12  ;;  %v6931_v12 = vld [vmem:[#allocation6_spill] sm:$0xff] }
  0x9e   : > { %4796 = vmatmul.mubr.msk.f32.gmra.mxu1 %vm254_vm1, %v5674_v38  ;;  %4848 = vmatprep.mubr.msk.f32.mxu0 %vm254_vm1, %v5353_v14  ;;  %v6932_v14 = vld [vmem:[#allocation7_spill] sm:$0xff] }
  0x9f   : > { %4798 = vmatprep.mubr.msk.f32.mxu1 %vm254_vm1, %v5680_v0 }
  0xa1   : > { %4849 = vmatmul.mubr.msk.f32.gmra.mxu0 %vm254_vm1, %v5371_v16  ;;  %v6933_v16 = vld [vmem:[#allocation8_spill] sm:$0xff] }
  0xa2   : > { %4799 = vmatmul.mubr.msk.f32.gmra.mxu1 %vm254_vm1, %v5694_v2  ;;  %4851 = vmatprep.mubr.msk.f32.mxu0 %vm254_vm1, %v5377_v18  ;;  %v6934_v18 = vld [vmem:[#allocation9_spill] sm:$0xff] }
  0xa3   : > { %4801 = vmatprep.mubr.msk.f32.mxu1 %vm254_vm1, %v5700_v60 }
  0xa5   : > { %4852 = vmatmul.mubr.msk.f32.gmra.mxu0 %vm254_vm1, %v5391_v20  ;;  %v6935_v20 = vld [vmem:[#allocation10_spill] sm:$0xff] }
  0xa6   : > { %4802 = vmatmul.mubr.msk.f32.gmra.mxu1 %vm254_vm1, %v5714_v62  ;;  %4854 = vmatprep.mubr.msk.f32.mxu0 %vm254_vm1, %v5397_v22  ;;  %v6936_v22 = vld [vmem:[#allocation11_spill] sm:$0xff] }
  0xa7   : > { %4804 = vmatprep.mubr.msk.f32.mxu1 %vm254_vm1, %v5720_v56 }
  0xa9   : > { %4855 = vmatmul.mubr.msk.f32.gmra.mxu0 %vm254_vm1, %v5411_v24  ;;  %v6937_v24 = vld [vmem:[#allocation12_spill] sm:$0xff] }
  0xaa   : > { %4805 = vmatmul.mubr.msk.f32.gmra.mxu1 %vm254_vm1, %v5734_v58  ;;  %4857 = vmatprep.mubr.msk.f32.mxu0 %vm254_vm1, %v5417_v26  ;;  %v6938_v26 = vld [vmem:[#allocation13_spill] sm:$0xff] }
  0xab   : > { %4807 = vmatprep.mubr.msk.f32.mxu1 %vm254_vm1, %v5740_v52 }
  0xad   : > { %4858 = vmatmul.mubr.msk.f32.gmra.mxu0 %vm254_vm1, %v5431_v28  ;;  %v6939_v28 = vld [vmem:[#allocation14_spill] sm:$0xff] }
  0xae   : > { %4808 = vmatmul.mubr.msk.f32.gmra.mxu1 %vm254_vm1, %v5754_v54  ;;  %4860 = vmatprep.mubr.msk.f32.mxu0 %vm254_vm1, %v5437_v30  ;;  %v6941_v30 = vld [vmem:[#allocation16_spill] sm:$0xff] }
  0xaf   : > { %4810 = vmatprep.mubr.msk.f32.mxu1 %vm254_vm1, %v5760_v48 }
  0xb1   : > { %4861 = vmatmul.mubr.msk.f32.gmra.mxu0 %vm254_vm1, %v5451_v32  ;;  %v6943_v32 = vld [vmem:[#allocation18_spill] sm:$0xff] }
  0xb2   : > { %4811 = vmatmul.mubr.msk.f32.gmra.mxu1 %vm254_vm1, %v5774_v50  ;;  %4863 = vmatprep.mubr.msk.f32.mxu0 %vm254_vm1, %v5457_v34  ;;  %v6945_v34 = vld [vmem:[#allocation20_spill] sm:$0xff] }
  0xb3   : > { %4813 = vmatprep.mubr.msk.f32.mxu1 %vm254_vm1, %v5780_v42 }
  0xb5   : > { %4864 = vmatmul.mubr.msk.f32.gmra.mxu0 %vm254_vm1, %v6929_v7 }
  0xb6   : > { %4814 = vmatmul.mubr.msk.f32.gmra.mxu1 %vm254_vm1, %v5794_v46  ;;  %4866 = vmatprep.mubr.msk.f32.mxu0 %vm254_vm1, %v5941_v6  ;;  %v4147_v6 = vld [vmem:[%s5305_s9 + $0x198] sm:$0xff] }
  0xb7   : > { %4816 = vmatprep.mubr.msk.f32.mxu1 %vm254_vm1, %v5938_v4 }
  0xb9   : > { %4867 = vmatmul.mubr.msk.f32.gmra.mxu0 %vm254_vm1, %v5955_v11  ;;  %v6130_v11 = vld [vmem:[%s5305_s9 + $0x182] sm:$0xff] }
  0xba   : > { %4817 = vmatmul.mubr.msk.f32.gmra.mxu1 %vm254_vm1, %v5952_v8  ;;  %4921 = vmatprep.mubr.msk.f32.mxu0 %vm254_vm1, %v5516_v47  ;;  %6963 = vst [vmem:[#allocation10_spill] sm:$0xff] %v6130_v11 }
  0xbb   : > { %4871 = vmatprep.mubr.msk.f32.mxu1 %vm254_vm1, %v6931_v12 }
  0xbd   : > { %4922 = vmatmul.mubr.msk.f32.vlgmr.msra.gmra.mxu0 %vm254_vm1, %v5534_v49 }
  0xbe   : > { %4872 = vmatmul.mubr.msk.f32.vlgmr.msra.gmra.mxu1 %vm254_vm1, %v6932_v14  ;;  %5020 = vmatpush3.msk.msra.mxu0 %vm351_vm0, %v5819_v10 }
  0xbf   : > { %4970 = vmatpush3.msk.msra.mxu1 %vm351_vm0, %v5814_v36  ;;  %4874 = vmatprep.mubr.msk.f32.mxu1 %vm254_vm1, %v6933_v16  ;;  %v6947_v36 = vld [vmem:[#allocation22_spill] sm:$0xff] }
  0xc0   : > { %4924 = vmatprep.mubr.msk.f32.mxu0 %vm254_vm1, %v5540_v51 }
  0xc1   : > { %4925 = vmatmul.mubr.msk.f32.gmra.mxu0 %vm254_vm1, %v5554_v53 }
  0xc2   : > { %4875 = vmatmul.mubr.msk.f32.gmra.mxu1 %vm254_vm1, %v6934_v18  ;;  %4927 = vmatprep.mubr.msk.f32.mxu0 %vm254_vm1, %v5560_v55  ;;  %v6950_v55 = vld [vmem:[#allocation25_spill] sm:$0xff] }
  0xc3   : > { %4877 = vmatprep.mubr.msk.f32.mxu1 %vm254_vm1, %v6935_v20 }
  0xc5   : > { %4928 = vmatmul.mubr.msk.f32.gmra.mxu0 %vm254_vm1, %v5574_v57  ;;  %v6951_v57 = vld [vmem:[#allocation26_spill] sm:$0xff] }
  0xc6   : > { %4878 = vmatmul.mubr.msk.f32.gmra.mxu1 %vm254_vm1, %v6936_v22  ;;  %4930 = vmatprep.mubr.msk.f32.mxu0 %vm254_vm1, %v5580_v59 }
  0xc7   : > { %4880 = vmatprep.mubr.msk.f32.mxu1 %vm254_vm1, %v6937_v24 }
  0xc9   : > { %4931 = vmatmul.mubr.msk.f32.gmra.mxu0 %vm254_vm1, %v5594_v61 }
  0xca   : > { %4881 = vmatmul.mubr.msk.f32.gmra.mxu1 %vm254_vm1, %v6938_v26  ;;  %4933 = vmatprep.mubr.msk.f32.mxu0 %vm254_vm1, %v5600_v63 }
  0xcb   : > { %4883 = vmatprep.mubr.msk.f32.mxu1 %vm254_vm1, %v6939_v28 }
  0xcd   : > { %4934 = vmatmul.mubr.msk.f32.gmra.mxu0 %vm254_vm1, %v5614_v1 }
  0xce   : > { %4884 = vmatmul.mubr.msk.f32.gmra.mxu1 %vm254_vm1, %v6940_v29  ;;  %4936 = vmatprep.mubr.msk.f32.mxu0 %vm254_vm1, %v5620_v3 }
  0xcf   : > { %4886 = vmatprep.mubr.msk.f32.mxu1 %vm254_vm1, %v6941_v30 }
  0xd1   : > { %4937 = vmatmul.mubr.msk.f32.gmra.mxu0 %vm254_vm1, %v5634_v9 }
  0xd2   : > { %4887 = vmatmul.mubr.msk.f32.gmra.mxu1 %vm254_vm1, %v6942_v31  ;;  %4939 = vmatprep.mubr.msk.f32.mxu0 %vm254_vm1, %v5640_v37 }
  0xd3   : > { %4889 = vmatprep.mubr.msk.f32.mxu1 %vm254_vm1, %v6943_v32 }
  0xd5   : > { %4940 = vmatmul.mubr.msk.f32.gmra.mxu0 %vm254_vm1, %v5654_v39 }
  0xd6   : > { %4890 = vmatmul.mubr.msk.f32.gmra.mxu1 %vm254_vm1, %v6944_v33  ;;  %4942 = vmatprep.mubr.msk.f32.mxu0 %vm254_vm1, %v5660_v5  ;;  %v6954_v5 = vld [vmem:[#allocation29_spill] sm:$0xff] }
  0xd7   : > { %4892 = vmatprep.mubr.msk.f32.mxu1 %vm254_vm1, %v6945_v34 }
  0xd9   : > { %4943 = vmatmul.mubr.msk.f32.gmra.mxu0 %vm254_vm1, %v5674_v38  ;;  %v6957_v38 = vld [vmem:[#allocation31_spill] sm:$0xff] }
  0xda   : > { %4893 = vmatmul.mubr.msk.f32.gmra.mxu1 %vm254_vm1, %v6946_v35  ;;  %4945 = vmatprep.mubr.msk.f32.mxu0 %vm254_vm1, %v5680_v0  ;;  %v6952_v0 = vld [vmem:[#allocation27_spill] sm:$0xff] }
  0xdb   : > { %4895 = vmatprep.mubr.msk.f32.mxu1 %vm254_vm1, %v6947_v36 }
  0xdd   : > { %v6033_v41 = vpop.f32.mrf.mxu0  ;;  %4946 = vmatmul.mubr.msk.f32.gmra.mxu0 %vm254_vm1, %v5694_v2 }
  0xde   : > { %v6035_v43 = vpop.f32.mrf.mxu1  ;;  %4896 = vmatmul.mubr.msk.f32.gmra.mxu1 %vm254_vm1, %v6948_v44  ;;  %4948 = vmatprep.mubr.msk.f32.mxu0 %vm254_vm1, %v5700_v60 }
  0xdf   : > { %4898 = vmatprep.mubr.msk.f32.mxu1 %vm254_vm1, %v6949_v45  ;;  %v6045_v47 = vpop.f32.mrf.mxu0 }
  0xe0   : > { %v6047_v49 = vpop.f32.mrf.mxu1 }
  0xe1   : > { %v6049_v51 = vpop.f32.mrf.mxu0  ;;  %4949 = vmatmul.mubr.msk.f32.gmra.mxu0 %vm254_vm1, %v5714_v62  ;;  %v6953_v62 = vld [vmem:[#allocation28_spill] sm:$0xff] }
  0xe2   : > { %v6051_v53 = vpop.f32.mrf.mxu1  ;;  %4899 = vmatmul.mubr.msk.f32.gmra.mxu1 %vm254_vm1, %v6950_v55  ;;  %4951 = vmatprep.mubr.msk.f32.mxu0 %vm254_vm1, %v5720_v56 }
  0xe3   : > { %4901 = vmatprep.mubr.msk.f32.mxu1 %vm254_vm1, %v6951_v57  ;;  %v6061_v59 = vpop.f32.mrf.mxu0 }
  0xe4   : > { %v6063_v60 = vpop.f32.mrf.mxu1 }
  0xe5   : > { %v6065_v61 = vpop.f32.mrf.mxu0  ;;  %4952 = vmatmul.mubr.msk.f32.gmra.mxu0 %vm254_vm1, %v5734_v58  ;;  %v6955_v58 = vld [vmem:[#allocation30_spill] sm:$0xff] }
  0xe6   : > { %v6067_v63 = vpop.f32.mrf.mxu1  ;;  %4902 = vmatmul.mubr.msk.f32.gmra.mxu1 %vm254_vm1, %v6952_v0  ;;  %4954 = vmatprep.mubr.msk.f32.mxu0 %vm254_vm1, %v5740_v52 }
  0xe7   : > { %4904 = vmatprep.mubr.msk.f32.mxu1 %vm254_vm1, %v6953_v62  ;;  %v6077_v56 = vpop.f32.mrf.mxu0 }
  0xe8   : > { %v6079_v1 = vpop.f32.mrf.mxu1 }
  0xe9   : > { %v6081_v2 = vpop.f32.mrf.mxu0  ;;  %4955 = vmatmul.mubr.msk.f32.gmra.mxu0 %vm254_vm1, %v5754_v54  ;;  %v6958_v54 = vld [vmem:[#allocation32_spill] sm:$0xff] }
  0xea   : > { %v6083_v3 = vpop.f32.mrf.mxu1  ;;  %4905 = vmatmul.mubr.msk.f32.gmra.mxu1 %vm254_vm1, %v6954_v5  ;;  %4957 = vmatprep.mubr.msk.f32.mxu0 %vm254_vm1, %v5760_v48 }
  0xeb   : > { %4907 = vmatprep.mubr.msk.f32.mxu1 %vm254_vm1, %v6955_v58  ;;  %v6093_v52 = vpop.f32.mrf.mxu0 }
  0xec   : > { %v6095_v9 = vpop.f32.mrf.mxu1 }
  0xed   : > { %v6097_v10 = vpop.f32.mrf.mxu0  ;;  %4958 = vmatmul.mubr.msk.f32.gmra.mxu0 %vm254_vm1, %v5774_v50  ;;  %v6961_v50 = vld [vmem:[#allocation34_spill] sm:$0xff] }
  0xee   : > { %v6099_v37 = vpop.f32.mrf.mxu1  ;;  %4908 = vmatmul.mubr.msk.f32.gmra.mxu1 %vm254_vm1, %v6957_v38  ;;  %4960 = vmatprep.mubr.msk.f32.mxu0 %vm254_vm1, %v5780_v42 }
  0xef   : > { %6956 = vst [vmem:[#allocation6_spill] sm:$0xff] %v6099_v37  ;;  %4910 = vmatprep.mubr.msk.f32.mxu1 %vm254_vm1, %v6958_v54  ;;  %v6109_v48 = vpop.f32.mrf.mxu0  ;;  %v6965_v37 = vld [vmem:[#allocation35_spill] sm:$0xff] }
  0xf0   : > { %v6111_v39 = vpop.f32.mrf.mxu1 }
  0xf1   : > { %6959 = vst [vmem:[#allocation7_spill] sm:$0xff] %v6111_v39  ;;  %v6113_v7 = vpop.f32.mrf.mxu0  ;;  %4961 = vmatmul.mubr.msk.f32.gmra.mxu0 %vm254_vm1, %v5794_v46  ;;  %v6145_v46 = vld [vmem:[%s5305_s9 + $0x18a] sm:$0xff] }
  0xf2   : > { %v6115_v12 = vpop.f32.mrf.mxu1  ;;  %4911 = vmatmul.mubr.msk.f32.gmra.mxu1 %vm254_vm1, %v5777_v40  ;;  %4963 = vmatprep.mubr.msk.f32.mxu0 %vm254_vm1, %v5938_v4  ;;  %6966 = vst [vmem:[#allocation12_spill] sm:$0xff] %v6145_v46  ;;  %v4148_v4 = vld [vmem:[%s5305_s9 + $0x1a0] sm:$0xff] }
  0xf3   : > { %6960 = vst [vmem:[#allocation8_spill] sm:$0xff] %v6115_v12  ;;  %4913 = vmatprep.mubr.msk.f32.mxu1 %vm254_vm1, %v6961_v50  ;;  %v6125_v42 = vpop.f32.mrf.mxu0 }
  0xf4   : > { %v6127_v14 = vpop.f32.mrf.mxu1 }
  0xf5   : > { %6962 = vst [vmem:[#allocation9_spill] sm:$0xff] %v6127_v14  ;;  %v6133_v12 = vpop.f32.mrf.mxu0  ;;  %4964 = vmatmul.mubr.msk.f32.gmra.mxu0 %vm254_vm1, %v5952_v8 }
  0xf6   : > { %v6135_v39 = vpop.f32.mrf.mxu1  ;;  %4914 = vmatmul.mubr.msk.f32.gmra.mxu1 %vm254_vm1, %v6965_v37  ;;  %4966 = vmatprep.mubr.msk.f32.mxu0 %vm254_vm1, %v4147_v6 }
  0xf7   : > { %6964 = vst [vmem:[#allocation11_spill] sm:$0xff] %v6135_v39  ;;  %4916 = vmatprep.mubr.msk.f32.mxu1 %vm254_vm1, %v6130_v11  ;;  %v6148_v50 = vpop.f32.mrf.mxu0 }
  0xf8   : > { %v6150_v14 = vpop.f32.mrf.mxu1 }
  0xf9   : > { %6967 = vst [vmem:[#allocation13_spill] sm:$0xff] %v6150_v14  ;;  %v6152_v40 = vpop.f32.mrf.mxu0  ;;  %4967 = vmatmul.mubr.msk.f32.gmra.mxu0 %vm254_vm1, %v4148_v4 }
  0xfa   : > { %v6154_v39 = vpop.f32.mrf.mxu1  ;;  %4917 = vmatmul.mubr.msk.f32.gmra.mxu1 %vm254_vm1, %v6145_v46  ;;  %5021 = vmatprep.mubr.msk.f32.mxu0 %vm254_vm1, %v6933_v16 }
  0xfb   : > { %6968 = vst [vmem:[#allocation14_spill] sm:$0xff] %v6154_v39  ;;  %4971 = vmatprep.mubr.msk.f32.mxu1 %vm254_vm1, %v5350_v13  ;;  %v6163_v6 = vpop.f32.mrf.mxu0 }
  0xfc   : > { %v6165_v8 = vpop.f32.mrf.mxu1 }
  0xfd   : > { %6969 = vst [vmem:[#allocation15_spill] sm:$0xff] %v6165_v8  ;;  %v4723_v14 = vpop.f32.mrf.mxu0  ;;  %5022 = vmatmul.mubr.msk.f32.vlgmr.msra.gmra.mxu0 %vm254_vm1, %v6934_v18 }
  0xfe   : > { %v4673_v37 = vpop.f32.mrf.mxu1  ;;  %4972 = vmatmul.mubr.msk.f32.vlgmr.msra.gmra.mxu1 %vm254_vm1, %v5368_v15  ;;  %5024 = vmatprep.mubr.msk.f32.mxu0 %vm254_vm1, %v6935_v20 }
  0xff   : > { %v751_v4 = vadd.f32 %v4673_v37, %v6033_v41  ;;  %4974 = vmatprep.mubr.msk.f32.mxu1 %vm254_vm1, %v5374_v17  ;;  %v1103_v16 = vpop.f32.mrf.mxu0  ;;  %v4193_v37 = vld [vmem:[%s5305_s9 + $0xa9] sm:$0xff] }
 0x100   : > { %v745_v13 = vpop.f32.mrf.mxu1 }
 0x101   : > { %v6176_v39 = vadd.f32 %v4723_v14, %v751_v4  ;;  %v746_v8 = vadd.f32 %v745_v13, %v6045_v47  ;;  %v4726_v11 = vpop.f32.mrf.mxu0  ;;  %5025 = vmatmul.mubr.msk.f32.gmra.mxu0 %vm254_vm1, %v6936_v22 }
 0x102   : > { %v4676_v46 = vpop.f32.mrf.mxu1  ;;  %4975 = vmatmul.mubr.msk.f32.gmra.mxu1 %vm254_vm1, %v5388_v19  ;;  %5027 = vmatprep.mubr.msk.f32.mxu0 %vm254_vm1, %v6937_v24 }
 0x103   : > { %v6183_v15 = vadd.f32 %v1103_v16, %v746_v8  ;;  %v761_v17 = vadd.f32 %v4676_v46, %v6049_v51  ;;  %4977 = vmatprep.mubr.msk.f32.mxu1 %vm254_vm1, %v5394_v21  ;;  %v1113_v20 = vpop.f32.mrf.mxu0  ;;  %v4191_v51 = vld [vmem:[%s5305_s9 + $0x91] sm:$0xff] }
 0x104   : > { %v755_v18 = vpop.f32.mrf.mxu1  ;;  %v4194_v16 = vld [vmem:[%s5305_s9 + $0xb1] sm:$0xff] }
 0x105   : > { %v6190_v41 = vadd.f32 %v4726_v11, %v761_v17  ;;  %v756_v19 = vadd.f32 %v755_v18, %v6061_v59  ;;  %v4729_v14 = vpop.f32.mrf.mxu0  ;;  %5028 = vmatmul.mubr.msk.f32.gmra.mxu0 %vm254_vm1, %v6938_v26  ;;  %v4195_v18 = vld [vmem:[%s5305_s9 + $0xc1] sm:$0xff] }
 0x106   : > { %v4679_v47 = vpop.f32.mrf.mxu1  ;;  %4978 = vmatmul.mubr.msk.f32.gmra.mxu1 %vm254_vm1, %v5408_v23  ;;  %5030 = vmatprep.mubr.msk.f32.mxu0 %vm254_vm1, %v6939_v28 }
 0x107   : > { %v6197_v22 = vadd.f32 %v1113_v20, %v756_v19  ;;  %v771_v21 = vadd.f32 %v4679_v47, %v6065_v61  ;;  %4980 = vmatprep.mubr.msk.f32.mxu1 %vm254_vm1, %v5414_v25  ;;  %v1123_v24 = vpop.f32.mrf.mxu0  ;;  %v4192_v61 = vld [vmem:[%s5305_s9 + $0x99] sm:$0xff] }
 0x108   : > { %v765_v11 = vpop.f32.mrf.mxu1 }
 0x109   : > { %v6205_v59 = vadd.f32 %v4729_v14, %v771_v21  ;;  %v766_v23 = vadd.f32 %v765_v11, %v6077_v56  ;;  %v4732_v46 = vpop.f32.mrf.mxu0  ;;  %5031 = vmatmul.mubr.msk.f32.gmra.mxu0 %vm254_vm1, %v6940_v29  ;;  %v4196_v14 = vld [vmem:[%s5305_s9 + $0xc9] sm:$0xff]  ;;  %v4197_v11 = vld [vmem:[%s5305_s9 + $0xd9] sm:$0xff] }
 0x10a   : > { %v4682_v26 = vpop.f32.mrf.mxu1  ;;  %4981 = vmatmul.mubr.msk.f32.gmra.mxu1 %vm254_vm1, %v5428_v27  ;;  %5033 = vmatprep.mubr.msk.f32.mxu0 %vm254_vm1, %v6941_v30 }
 0x10b   : > { %v6212_v25 = vadd.f32 %v1123_v24, %v766_v23  ;;  %v781_v28 = vadd.f32 %v4682_v26, %v6081_v2  ;;  %4983 = vmatprep.mubr.msk.f32.mxu1 %vm254_vm1, %v4191_v51  ;;  %v1133_v8 = vpop.f32.mrf.mxu0  ;;  %v4198_v26 = vld [vmem:[%s5305_s9 + $0xe1] sm:$0xff] }
 0x10c   : > { %v775_v56 = vpop.f32.mrf.mxu1 }
 0x10d   : > { %v6220_v4 = vadd.f32 %v4732_v46, %v781_v28  ;;  %v776_v27 = vadd.f32 %v775_v56, %v6093_v52  ;;  %v4735_v13 = vpop.f32.mrf.mxu0  ;;  %5034 = vmatmul.mubr.msk.f32.gmra.mxu0 %vm254_vm1, %v6942_v31  ;;  %v4199_v28 = vld [vmem:[%s5305_s9 + $0xf1] sm:$0xff] }
 0x10e   : > { %v4685_v29 = vpop.f32.mrf.mxu1  ;;  %4984 = vmatmul.mubr.msk.f32.gmra.mxu1 %vm254_vm1, %v4192_v61  ;;  %5036 = vmatprep.mubr.msk.f32.mxu0 %vm254_vm1, %v6943_v32 }
 0x10f   : > { %v6226_v2 = vadd.f32 %v1133_v8, %v776_v27  ;;  %v791_v30 = vadd.f32 %v4685_v29, %v6097_v10  ;;  %4986 = vmatprep.mubr.msk.f32.mxu1 %vm254_vm1, %v4193_v37  ;;  %v1143_v52 = vpop.f32.mrf.mxu0  ;;  %v4200_v37 = vld [vmem:[%s5305_s9 + $0xf9] sm:$0xff]  ;;  %v4201_v29 = vld [vmem:[%s5305_s9 + $0x109] sm:$0xff] }
 0x110   : > { %v785_v17 = vpop.f32.mrf.mxu1 }
 0x111   : > { %v6234_v20 = vadd.f32 %v4735_v13, %v791_v30  ;;  %v786_v19 = vadd.f32 %v785_v17, %v6109_v48  ;;  %v4738_v47 = vpop.f32.mrf.mxu0  ;;  %5037 = vmatmul.mubr.msk.f32.gmra.mxu0 %vm254_vm1, %v6944_v33  ;;  %v4202_v17 = vld [vmem:[%s5305_s9 + $0x111] sm:$0xff] }
 0x112   : > { %v4688_v31 = vpop.f32.mrf.mxu1  ;;  %4987 = vmatmul.mubr.msk.f32.gmra.mxu1 %vm254_vm1, %v4194_v16  ;;  %5039 = vmatprep.mubr.msk.f32.mxu0 %vm254_vm1, %v6945_v34 }
 0x113   : > { %v6240_v10 = vadd.f32 %v1143_v52, %v786_v19  ;;  %v801_v32 = vadd.f32 %v4688_v31, %v6113_v7  ;;  %4989 = vmatprep.mubr.msk.f32.mxu1 %vm254_vm1, %v4195_v18  ;;  %v1153_v48 = vpop.f32.mrf.mxu0  ;;  %v4203_v18 = vld [vmem:[%s5305_s9 + $0x121] sm:$0xff] }
 0x114   : > { %v795_v21 = vpop.f32.mrf.mxu1 }
 0x115   : > { %v6248_v24 = vadd.f32 %v4738_v47, %v801_v32  ;;  %v796_v51 = vadd.f32 %v795_v21, %v6125_v42  ;;  %v4741_v23 = vpop.f32.mrf.mxu0  ;;  %5040 = vmatmul.mubr.msk.f32.gmra.mxu0 %vm254_vm1, %v6946_v35  ;;  %v4204_v32 = vld [vmem:[%s5305_s9 + $0x129] sm:$0xff]  ;;  %v4205_v21 = vld [vmem:[%s5305_s9 + $0x139] sm:$0xff] }
 0x116   : > { %v4691_v33 = vpop.f32.mrf.mxu1  ;;  %4990 = vmatmul.mubr.msk.f32.gmra.mxu1 %vm254_vm1, %v4196_v14  ;;  %5042 = vmatprep.mubr.msk.f32.mxu0 %vm254_vm1, %v6947_v36 }
 0x117   : > { %v6254_v7 = vadd.f32 %v1153_v48, %v796_v51  ;;  %v811_v34 = vadd.f32 %v4691_v33, %v6133_v12  ;;  %4992 = vmatprep.mubr.msk.f32.mxu1 %vm254_vm1, %v4197_v11  ;;  %v1163_v42 = vpop.f32.mrf.mxu0  ;;  %v4206_v33 = vld [vmem:[%s5305_s9 + $0x141] sm:$0xff] }
 0x118   : > { %v805_v46 = vpop.f32.mrf.mxu1 }
 0x119   : > { %v6262_v61 = vadd.f32 %v4741_v23, %v811_v34  ;;  %v806_v56 = vadd.f32 %v805_v46, %v6148_v50  ;;  %v4744_v8 = vpop.f32.mrf.mxu0  ;;  %5043 = vmatmul.mubr.msk.f32.gmra.mxu0 %vm254_vm1, %v6948_v44  ;;  %v4207_v34 = vld [vmem:[%s5305_s9 + $0x151] sm:$0xff] }
 0x11a   : > { %v4694_v35 = vpop.f32.mrf.mxu1  ;;  %4993 = vmatmul.mubr.msk.f32.gmra.mxu1 %vm254_vm1, %v4198_v26  ;;  %5045 = vmatprep.mubr.msk.f32.mxu0 %vm254_vm1, %v6949_v45 }
 0x11b   : > { %v6268_v12 = vadd.f32 %v1163_v42, %v806_v56  ;;  %v821_v36 = vadd.f32 %v4694_v35, %v6152_v40  ;;  %4995 = vmatprep.mubr.msk.f32.mxu1 %vm254_vm1, %v4199_v28  ;;  %v1173_v50 = vpop.f32.mrf.mxu0  ;;  %v4208_v28 = vld [vmem:[%s5305_s9 + $0x159] sm:$0xff]  ;;  %v4209_v35 = vld [vmem:[%s5305_s9 + $0x169] sm:$0xff] }
 0x11c   : > { %v815_v27 = vpop.f32.mrf.mxu1 }
 0x11d   : > { %v6276_v13 = vadd.f32 %v4744_v8, %v821_v36  ;;  %v816_v30 = vadd.f32 %v815_v27, %v6163_v6  ;;  %v4747_v16 = vpop.f32.mrf.mxu0  ;;  %5046 = vmatmul.mubr.msk.f32.gmra.mxu0 %vm254_vm1, %v6950_v55  ;;  %v4275_v8 = vld [vmem:[%s5305_s9 + $0x16a] sm:$0xff] }
 0x11e   : > { %v4697_v44 = vpop.f32.mrf.mxu1  ;;  %4996 = vmatmul.mubr.msk.f32.gmra.mxu1 %vm254_vm1, %v4200_v37  ;;  %5048 = vmatprep.mubr.msk.f32.mxu0 %vm254_vm1, %v6951_v57 }
 0x11f   : > { %v6282_v40 = vadd.f32 %v1173_v50, %v816_v30  ;;  %v831_v45 = vadd.f32 %v4697_v44, %v6035_v43  ;;  %4998 = vmatprep.mubr.msk.f32.mxu1 %vm254_vm1, %v4201_v29  ;;  %v1183_v6 = vpop.f32.mrf.mxu0  ;;  %v4210_v30 = vld [vmem:[%s5305_s9 + $0x171] sm:$0xff] }
 0x120   : > { %v825_v52 = vpop.f32.mrf.mxu1  ;;  %v4276_v44 = vld [vmem:[%s5305_s9 + $0x172] sm:$0xff] }
 0x121   : > { %v6290_v19 = vadd.f32 %v4747_v16, %v831_v45  ;;  %v826_v31 = vadd.f32 %v825_v52, %v6047_v49  ;;  %v4750_v47 = vpop.f32.mrf.mxu0  ;;  %5049 = vmatmul.mubr.msk.f32.gmra.mxu0 %vm254_vm1, %v6952_v0 }
 0x122   : > { %v4700_v55 = vpop.f32.mrf.mxu1  ;;  %4999 = vmatmul.mubr.msk.f32.gmra.mxu1 %vm254_vm1, %v4202_v17  ;;  %5051 = vmatprep.mubr.msk.f32.mxu0 %vm254_vm1, %v6953_v62  ;;  %v6972_v17 = vld [vmem:[#allocation7_spill] sm:$0xff] }
 0x123   : > { %v6296_v43 = vadd.f32 %v1183_v6, %v826_v31  ;;  %v841_v57 = vadd.f32 %v4700_v55, %v6051_v53  ;;  %5001 = vmatprep.mubr.msk.f32.mxu1 %vm254_vm1, %v4203_v18  ;;  %v1193_v49 = vpop.f32.mrf.mxu0  ;;  %v6973_v55 = vld [vmem:[#allocation8_spill] sm:$0xff] }
 0x124   : > { %v835_v14 = vpop.f32.mrf.mxu1 }
 0x125   : > { %v6304_v48 = vadd.f32 %v4750_v47, %v841_v57  ;;  %v836_v11 = vadd.f32 %v835_v14, %v6063_v60  ;;  %v4753_v51 = vpop.f32.mrf.mxu0  ;;  %5052 = vmatmul.mubr.msk.f32.gmra.mxu0 %vm254_vm1, %v6954_v5  ;;  %v6974_v57 = vld [vmem:[#allocation36_spill] sm:$0xff] }
 0x126   : > { %v4703_v0 = vpop.f32.mrf.mxu1  ;;  %5002 = vmatmul.mubr.msk.f32.gmra.mxu1 %vm254_vm1, %v4204_v32  ;;  %5054 = vmatprep.mubr.msk.f32.mxu0 %vm254_vm1, %v6955_v58  ;;  %v6975_v32 = vld [vmem:[#allocation10_spill] sm:$0xff] }
 0x127   : > { %v6310_v53 = vadd.f32 %v1193_v49, %v836_v11  ;;  %v851_v62 = vadd.f32 %v4703_v0, %v6067_v63  ;;  %5004 = vmatprep.mubr.msk.f32.mxu1 %vm254_vm1, %v4205_v21  ;;  %v1203_v60 = vpop.f32.mrf.mxu0  ;;  %v4213_v21 = vld [vmem:[%s5305_s9 + $0x199] sm:$0xff] }
 0x128   : > { %v845_v23 = vpop.f32.mrf.mxu1  ;;  %v4279_v11 = vld [vmem:[%s5305_s9 + $0x19a] sm:$0xff] }
 0x129   : > { %v6318_v26 = vadd.f32 %v4753_v51, %v851_v62  ;;  %v846_v5 = vadd.f32 %v845_v23, %v6079_v1  ;;  %v4756_v42 = vpop.f32.mrf.mxu0  ;;  %5055 = vmatmul.mubr.msk.f32.gmra.mxu0 %vm254_vm1, %v6957_v38  ;;  %v6976_v51 = vld [vmem:[#allocation9_spill] sm:$0xff] }
 0x12a   : > { %v4706_v46 = vpop.f32.mrf.mxu1  ;;  %5005 = vmatmul.mubr.msk.f32.gmra.mxu1 %vm254_vm1, %v4206_v33  ;;  %5057 = vmatprep.mubr.msk.f32.mxu0 %vm254_vm1, %v6958_v54  ;;  %v6971_v54 = vld [vmem:[#allocation6_spill] sm:$0xff] }
 0x12b   : > { %v6324_v63 = vadd.f32 %v1203_v60, %v846_v5  ;;  %v861_v58 = vadd.f32 %v4706_v46, %v6083_v3  ;;  %5007 = vmatprep.mubr.msk.f32.mxu1 %vm254_vm1, %v4207_v34  ;;  %v1213_v56 = vpop.f32.mrf.mxu0  ;;  %v6970_v3 = vld [vmem:[#allocation33_spill] sm:$0xff]  ;;  %v6978_v34 = vld [vmem:[#allocation12_spill] sm:$0xff]  ;;  %v6979_v46 = vld [vmem:[#allocation11_spill] sm:$0xff] }
 0x12c   : > { %v855_v1 = vpop.f32.mrf.mxu1  ;;  %v6977_v60 = vld [vmem:[#allocation5_spill] sm:$0xff] }
 0x12d   : > { %v6333_v36 = vadd.f32 %v4756_v42, %v861_v58  ;;  %v856_v38 = vadd.f32 %v855_v1, %v6095_v9  ;;  %v4759_v27 = vpop.f32.mrf.mxu0  ;;  %5058 = vmatmul.mubr.msk.f32.gmra.mxu0 %vm254_vm1, %v6970_v3  ;;  %v4214_v58 = vld [vmem:[%s5305_s9 + $0x1a1] sm:$0xff] }
 0x12e   : > { %v4709_v37 = vpop.f32.mrf.mxu1  ;;  %5008 = vmatmul.mubr.msk.f32.gmra.mxu1 %vm254_vm1, %v4208_v28  ;;  %5060 = vmatprep.mubr.msk.f32.mxu0 %vm254_vm1, %v4275_v8  ;;  %v4280_v28 = vld [vmem:[%s5305_s9 + $0x1a2] sm:$0xff]  ;;  %s6633_s9 = scalar_lea.vmem [#allocation2], %s3816_s6 }
 0x12f   : > { %v6339_v50 = vadd.f32 %v1213_v56, %v856_v38  ;;  %v871_v29 = vadd.f32 %v4709_v37, %v6971_v54  ;;  %5010 = vmatprep.mubr.msk.f32.mxu1 %vm254_vm1, %v4209_v35  ;;  %v1223_v16 = vpop.f32.mrf.mxu0  ;;  %v6980_v8 = vld [vmem:[#allocation13_spill] sm:$0xff]  ;;  %v6981_v54 = vld [vmem:[#allocation14_spill] sm:$0xff]  ;;  %s3728_s11 = sshll.u32 %s6633_s9, 4  ;;  %s6779_s11 = int_to_ptr.vmem [resolvable:$true] %s3728_s11 }
 0x130   : > { %v865_v9 = vpop.f32.mrf.mxu1  ;;  %s5129_s23 = scalar_lea.vmem %s6779_s11, 4096  ;;  %p5136_p1 = scmp.lt.s32.totalorder %s6779_s11, %s5134_s27 }
 0x131   : > { %v6346_v45 = vadd.f32 %v4759_v27, %v871_v29  ;;  %v866_v52 = vadd.f32 %v865_v9, %v6972_v17  ;;  %v4762_v18 = vpop.f32.mrf.mxu0  ;;  %5061 = vmatmul.mubr.msk.f32.gmra.mxu0 %vm254_vm1, %v4276_v44  ;;  %p5130_p12 = scmp.ne.s32.totalorder %s6779_s11, %s5129_s23  ;;  %p5137_p2 = scmp.lt.s32.totalorder %s5135_s28, %s5129_s23 }
 0x132   : > { %v4712_v6 = vpop.f32.mrf.mxu1  ;;  %5011 = vmatmul.mubr.msk.f32.gmra.mxu1 %vm254_vm1, %v4210_v30  ;;  %5063 = vmatprep.mubr.msk.f32.mxu0 %vm254_vm1, %v6975_v32 }
 0x133   : > { %v6351_v31 = vadd.f32 %v1223_v16, %v866_v52  ;;  %v881_v47 = vadd.f32 %v4712_v6, %v6973_v55  ;;  %5013 = vmatprep.mubr.msk.f32.mxu1 %vm254_vm1, %v6974_v57  ;;  %v1233_v49 = vpop.f32.mrf.mxu0  ;;  %v6982_v16 = vld [vmem:[#allocation15_spill] sm:$0xff]  ;;  %p5131_p13 = pnand %p5130_p12, %p5270_p4  ;;  %p5138_p3 = por %p5137_p2, %p5136_p1 }
 0x134   : > { %v875_v14 = vpop.f32.mrf.mxu1 }
 0x135   : > { %v6360_v0 = vadd.f32 %v4762_v18, %v881_v47  ;;  %v876_v62 = vadd.f32 %v875_v14, %v6976_v51  ;;  %v4765_v23 = vpop.f32.mrf.mxu0  ;;  %5064 = vmatmul.mubr.msk.f32.gmra.mxu0 %vm254_vm1, %v6978_v34  ;;  %p5132_p0 = pneg %p5131_p13 }
 0x136   : > { %v4715_v33 = vpop.f32.mrf.mxu1  ;;  %5014 = vmatmul.mubr.msk.f32.gmra.mxu1 %vm254_vm1, %v6977_v60  ;;  %5066 = vmatprep.mubr.msk.f32.mxu0 %vm254_vm1, %v4279_v11 }
 0x137   : > { %v6367_v5 = vadd.f32 %v1233_v49, %v876_v62  ;;  %v891_v42 = vadd.f32 %v4715_v33, %v6979_v46  ;;  %5016 = vmatprep.mubr.msk.f32.mxu1 %vm254_vm1, %v4213_v21  ;;  %v1243_v56 = vpop.f32.mrf.mxu0  ;;  %p5139_p5 = pnand %p5138_p3, %p5132_p0 }
 0x138   : > { %v885_v1 = vpop.f32.mrf.mxu1 }
 0x139   : > { %v6374_v35 = vadd.f32 %v4765_v23, %v891_v42  ;;  %v886_v38 = vadd.f32 %v885_v1, %v6980_v8  ;;  %v4768_v27 = vpop.f32.mrf.mxu0  ;;  %5067 = vmatmul.mubr.msk.f32.gmra.mxu0 %vm254_vm1, %v4280_v28 }
 0x13a   : > { %v4718_v37 = vpop.f32.mrf.mxu1  ;;  %5017 = vmatmul.mubr.msk.f32.gmra.mxu1 %vm254_vm1, %v4214_v58 }
 0x13b   : > { %v6379_v3 = vadd.f32 %v1243_v56, %v886_v38  ;;  %v901_v29 = vadd.f32 %v4718_v37, %v6981_v54  ;;  %v1253_v44 = vpop.f32.mrf.mxu0 }
 0x13c   : > { %v895_v30 = vpop.f32.mrf.mxu1 }
 0x13d   : > { %v6382_v9 = vadd.f32 %v4768_v27, %v901_v29  ;;  %v896_v17 = vadd.f32 %v895_v30, %v6982_v16  ;;  %v4823_v6 = vpop.f32.mrf.mxu0 }
 0x13e   : > { %v4773_v52 = vpop.f32.mrf.mxu1 }
 0x13f   : > { %v6385_v18 = vadd.f32 %v1253_v44, %v896_v17  ;;  %v1656_v55 = vadd.f32 %v4773_v52, %v6176_v39  ;;  %v1886_v57 = vpop.f32.mrf.mxu0 }
 0x140   : > { %v1496_v47 = vpop.f32.mrf.mxu1 }
 0x141   : > { %v6388_v32 = vadd.f32 %v4823_v6, %v1656_v55  ;;  %v1655_v14 = vadd.f32 %v1496_v47, %v6183_v15  ;;  %v4826_v21 = vpop.f32.mrf.mxu0 }
 0x142   : > { %v4776_v49 = vpop.f32.mrf.mxu1 }
 0x143   : > { %v6391_v11 = vadd.f32 %v1886_v57, %v1655_v14  ;;  %v1658_v51 = vadd.f32 %v4776_v49, %v6190_v41  ;;  %v1896_v33 = vpop.f32.mrf.mxu0 }
 0x144   : > { %v1506_v62 = vpop.f32.mrf.mxu1 }
 0x145   : > { %v6394_v23 = vadd.f32 %v4826_v21, %v1658_v51  ;;  %v1657_v60 = vadd.f32 %v1506_v62, %v6197_v22  ;;  %v4829_v39 = vpop.f32.mrf.mxu0 }
 0x146   : > { %v4779_v34 = vpop.f32.mrf.mxu1 }
 0x147   : > { %v6397_v46 = vadd.f32 %v1896_v33, %v1657_v60  ;;  %v1660_v42 = vadd.f32 %v4779_v34, %v6205_v59  ;;  %v1906_v15 = vpop.f32.mrf.mxu0 }
 0x148   : > { %v1516_v58 = vpop.f32.mrf.mxu1 }
 0x149   : > { %v6400_v28 = vadd.f32 %v4829_v39, %v1660_v42  ;;  %v1659_v1 = vadd.f32 %v1516_v58, %v6212_v25  ;;  %v4832_v41 = vpop.f32.mrf.mxu0 }
 0x14a   : > { %v4782_v56 = vpop.f32.mrf.mxu1 }
 0x14b   : > { %v6403_v8 = vadd.f32 %v1906_v15, %v1659_v1  ;;  %v1662_v38 = vadd.f32 %v4782_v56, %v6220_v4  ;;  %v1916_v22 = vpop.f32.mrf.mxu0 }
 0x14c   : > { %v1526_v37 = vpop.f32.mrf.mxu1 }
 0x14d   : > { %v6406_v27 = vadd.f32 %v4832_v41, %v1662_v38  ;;  %v1661_v54 = vadd.f32 %v1526_v37, %v6226_v2  ;;  %v4835_v59 = vpop.f32.mrf.mxu0 }
 0x14e   : > { %v4785_v29 = vpop.f32.mrf.mxu1 }
 0x14f   : > { %v6409_v30 = vadd.f32 %v1916_v22, %v1661_v54  ;;  %v1664_v44 = vadd.f32 %v4785_v29, %v6234_v20  ;;  %v1926_v25 = vpop.f32.mrf.mxu0 }
 0x150   : > { %v1536_v16 = vpop.f32.mrf.mxu1 }
 0x151   : > { %v6412_v17 = vadd.f32 %v4835_v59, %v1664_v44  ;;  %v1663_v52 = vadd.f32 %v1536_v16, %v6240_v10  ;;  %v4838_v4 = vpop.f32.mrf.mxu0 }
 0x152   : > { %v4788_v6 = vpop.f32.mrf.mxu1 }
 0x153   : > { %v6415_v55 = vadd.f32 %v1926_v25, %v1663_v52  ;;  %v1666_v47 = vadd.f32 %v4788_v6, %v6248_v24  ;;  %v1936_v2 = vpop.f32.mrf.mxu0 }
 0x154   : > { %v1546_v57 = vpop.f32.mrf.mxu1 }
 0x155   : > { %v6418_v14 = vadd.f32 %v4838_v4, %v1666_v47  ;;  %v1665_v49 = vadd.f32 %v1546_v57, %v6254_v7  ;;  %v4841_v20 = vpop.f32.mrf.mxu0 }
 0x156   : > { %v4791_v21 = vpop.f32.mrf.mxu1 }
 0x157   : > { %v6421_v51 = vadd.f32 %v1936_v2, %v1665_v49  ;;  %v1668_v62 = vadd.f32 %v4791_v21, %v6262_v61  ;;  %v1946_v10 = vpop.f32.mrf.mxu0 }
 0x158   : > { %v1556_v33 = vpop.f32.mrf.mxu1 }
 0x159   : > { %v6424_v60 = vadd.f32 %v4841_v20, %v1668_v62  ;;  %v1667_v34 = vadd.f32 %v1556_v33, %v6268_v12  ;;  %v4844_v24 = vpop.f32.mrf.mxu0 }
 0x15a   : > { %v4794_v39 = vpop.f32.mrf.mxu1 }
 0x15b   : > { %v6427_v42 = vadd.f32 %v1946_v10, %v1667_v34  ;;  %v1670_v58 = vadd.f32 %v4794_v39, %v6276_v13  ;;  %v1956_v7 = vpop.f32.mrf.mxu0 }
 0x15c   : > { %v1566_v15 = vpop.f32.mrf.mxu1 }
 0x15d   : > { %v6430_v1 = vadd.f32 %v4844_v24, %v1670_v58  ;;  %v1669_v56 = vadd.f32 %v1566_v15, %v6282_v40  ;;  %v4847_v61 = vpop.f32.mrf.mxu0 }
 0x15e   : > { %v4797_v41 = vpop.f32.mrf.mxu1 }
 0x15f   : > { %v6433_v38 = vadd.f32 %v1956_v7, %v1669_v56  ;;  %v1672_v37 = vadd.f32 %v4797_v41, %v6290_v19  ;;  %v1966_v12 = vpop.f32.mrf.mxu0 }
 0x160   : > { %v1576_v22 = vpop.f32.mrf.mxu1 }
 0x161   : > { %v6436_v54 = vadd.f32 %v4847_v61, %v1672_v37  ;;  %v1671_v29 = vadd.f32 %v1576_v22, %v6296_v43  ;;  %v4850_v13 = vpop.f32.mrf.mxu0 }
 0x162   : > { %v4800_v59 = vpop.f32.mrf.mxu1 }
 0x163   : > { %v6439_v44 = vadd.f32 %v1966_v12, %v1671_v29  ;;  %v1674_v16 = vadd.f32 %v4800_v59, %v6304_v48  ;;  %v1976_v40 = vpop.f32.mrf.mxu0 }
 0x164   : > { %v1586_v25 = vpop.f32.mrf.mxu1 }
 0x165   : > { %v6442_v52 = vadd.f32 %v4850_v13, %v1674_v16  ;;  %v1673_v6 = vadd.f32 %v1586_v25, %v6310_v53  ;;  %v4853_v19 = vpop.f32.mrf.mxu0 }
 0x166   : > { %v4803_v4 = vpop.f32.mrf.mxu1 }
 0x167   : > { %6983 = vst [vmem:[#allocation16_spill] sm:$0xff] %v6442_v52  ;;  %v6445_v47 = vadd.f32 %v1976_v40, %v1673_v6  ;;  %v1676_v57 = vadd.f32 %v4803_v4, %v6318_v26  ;;  %v1986_v43 = vpop.f32.mrf.mxu0 }
 0x168   : > { %v1596_v2 = vpop.f32.mrf.mxu1 }
 0x169   : > { %6984 = vst [vmem:[#allocation17_spill] sm:$0xff] %v6445_v47  ;;  %v6448_v49 = vadd.f32 %v4853_v19, %v1676_v57  ;;  %v1675_v21 = vadd.f32 %v1596_v2, %v6324_v63  ;;  %v4856_v48 = vpop.f32.mrf.mxu0 }
 0x16a   : > { %v4806_v20 = vpop.f32.mrf.mxu1 }
 0x16b   : > { %6985 = vst [vmem:[#allocation18_spill] sm:$0xff] %v6448_v49  ;;  %v6451_v62 = vadd.f32 %v1986_v43, %v1675_v21  ;;  %v1678_v33 = vadd.f32 %v4806_v20, %v6333_v36  ;;  %v1996_v53 = vpop.f32.mrf.mxu0 }
 0x16c   : > { %v1606_v10 = vpop.f32.mrf.mxu1 }
 0x16d   : > { %6986 = vst [vmem:[#allocation19_spill] sm:$0xff] %v6451_v62  ;;  %v6454_v34 = vadd.f32 %v4856_v48, %v1678_v33  ;;  %v1677_v39 = vadd.f32 %v1606_v10, %v6339_v50  ;;  %v4859_v26 = vpop.f32.mrf.mxu0 }
 0x16e   : > { %v4809_v24 = vpop.f32.mrf.mxu1 }
 0x16f   : > { %6987 = vst [vmem:[#allocation20_spill] sm:$0xff] %v6454_v34  ;;  %v6457_v58 = vadd.f32 %v1996_v53, %v1677_v39  ;;  %v1680_v15 = vadd.f32 %v4809_v24, %v6346_v45  ;;  %v2006_v63 = vpop.f32.mrf.mxu0 }
 0x170   : > { %v1616_v7 = vpop.f32.mrf.mxu1 }
 0x171   : > { %6988 = vst [vmem:[#allocation21_spill] sm:$0xff] %v6457_v58  ;;  %v6460_v56 = vadd.f32 %v4859_v26, %v1680_v15  ;;  %v1679_v41 = vadd.f32 %v1616_v7, %v6351_v31  ;;  %v4862_v36 = vpop.f32.mrf.mxu0 }
 0x172   : > { %v4812_v61 = vpop.f32.mrf.mxu1 }
 0x173   : > { %6989 = vst [vmem:[#allocation22_spill] sm:$0xff] %v6460_v56  ;;  %v6463_v37 = vadd.f32 %v2006_v63, %v1679_v41  ;;  %v1682_v22 = vadd.f32 %v4812_v61, %v6360_v0  ;;  %v2016_v50 = vpop.f32.mrf.mxu0 }
 0x174   : > { %v1626_v12 = vpop.f32.mrf.mxu1 }
 0x175   : > { %6990 = vst [vmem:[#allocation23_spill] sm:$0xff] %v6463_v37  ;;  %v6466_v29 = vadd.f32 %v4862_v36, %v1682_v22  ;;  %v1681_v59 = vadd.f32 %v1626_v12, %v6367_v5  ;;  %v4865_v45 = vpop.f32.mrf.mxu0 }
 0x176   : > { %v4815_v13 = vpop.f32.mrf.mxu1 }
 0x177   : > { %6991 = vst [vmem:[#allocation24_spill] sm:$0xff] %v6466_v29  ;;  %v6469_v16 = vadd.f32 %v2016_v50, %v1681_v59  ;;  %v1684_v25 = vadd.f32 %v4815_v13, %v6374_v35  ;;  %v2026_v31 = vpop.f32.mrf.mxu0 }
 0x178   : > { %v1636_v40 = vpop.f32.mrf.mxu1 }
 0x179   : > { %6992 = vst [vmem:[#allocation25_spill] sm:$0xff] %v6469_v16  ;;  %v6472_v6 = vadd.f32 %v4865_v45, %v1684_v25  ;;  %v1683_v4 = vadd.f32 %v1636_v40, %v6379_v3  ;;  %v4868_v0 = vpop.f32.mrf.mxu0 }
 0x17a   : > { %v4818_v19 = vpop.f32.mrf.mxu1 }
 0x17b   : > { %6993 = vst [vmem:[#allocation26_spill] sm:$0xff] %v6472_v6  ;;  %v6475_v57 = vadd.f32 %v2026_v31, %v1683_v4  ;;  %v1686_v2 = vadd.f32 %v4818_v19, %v6382_v9  ;;  %v2036_v5 = vpop.f32.mrf.mxu0 }
 0x17c   : > { %v1646_v43 = vpop.f32.mrf.mxu1 }
 0x17d   : > { %6994 = vst [vmem:[#allocation27_spill] sm:$0xff] %v6475_v57  ;;  %v6478_v21 = vadd.f32 %v4868_v0, %v1686_v2  ;;  %v1685_v20 = vadd.f32 %v1646_v43, %v6385_v18  ;;  %v6481_v35 = vpop.f32.mrf.mxu0 }
 0x17e   : > { %v4873_v48 = vpop.f32.mrf.mxu1 }
 0x17f   : > { %6995 = vst [vmem:[#allocation28_spill] sm:$0xff] %v6478_v21  ;;  %v6483_v33 = vadd.f32 %v2036_v5, %v1685_v20  ;;  %v6485_v53 = vpop.f32.mrf.mxu0 }
 0x180   : > { %v2276_v10 = vpop.f32.mrf.mxu1 }
 0x181   : > { %6996 = vst [vmem:[#allocation29_spill] sm:$0xff] %v6483_v33  ;;  %v6489_v39 = vpop.f32.mrf.mxu0 }
 0x182   : > { %v6487_v3 = vpop.f32.mrf.mxu1 }
 0x183   : > { %v6493_v9 = vpop.f32.mrf.mxu0 }
 0x184   : > { %v6491_v24 = vpop.f32.mrf.mxu1 }
 0x185   : > { %v6497_v15 = vpop.f32.mrf.mxu0 }
 0x186   : > { %v6495_v26 = vpop.f32.mrf.mxu1 }
 0x187   : > { %v6501_v7 = vpop.f32.mrf.mxu0 }
 0x188   : > { %v6499_v18 = vpop.f32.mrf.mxu1 }
 0x189   : > { %v6505_v41 = vpop.f32.mrf.mxu0 }
 0x18a   : > { %v6503_v63 = vpop.f32.mrf.mxu1 }
 0x18b   : > { %v6509_v36 = vpop.f32.mrf.mxu0 }
 0x18c   : > { %v6507_v61 = vpop.f32.mrf.mxu1 }
 0x18d   : > { %v6513_v12 = vpop.f32.mrf.mxu0 }
 0x18e   : > { %v6511_v22 = vpop.f32.mrf.mxu1 }
 0x18f   : > { %v6517_v59 = vpop.f32.mrf.mxu0 }
 0x190   : > { %v6515_v50 = vpop.f32.mrf.mxu1 }
 0x191   : > { %v6521_v45 = vpop.f32.mrf.mxu0 }
 0x192   : > { %v6519_v13 = vpop.f32.mrf.mxu1 }
 0x193   : > { %v6525_v40 = vpop.f32.mrf.mxu0 }
 0x194   : > { %v6523_v25 = vpop.f32.mrf.mxu1 }
 0x195   : > { %v6529_v4 = vpop.f32.mrf.mxu0 }
 0x196   : > { %v6527_v31 = vpop.f32.mrf.mxu1 }
 0x197   : > { %v6533_v0 = vpop.f32.mrf.mxu0 }
 0x198   : > { %v6531_v19 = vpop.f32.mrf.mxu1 }
 0x199   : > { %v6537_v43 = vpop.f32.mrf.mxu0 }
 0x19a   : > { %v6535_v2 = vpop.f32.mrf.mxu1 }
 0x19b   : > { %v6541_v20 = vpop.f32.mrf.mxu0 }
 0x19c   : > { %v6539_v5 = vpop.f32.mrf.mxu1 }
 0x19d   : > { %v6545_v21 = vpop.f32.mrf.mxu0 }
 0x19e   : > { %v6543_v33 = vpop.f32.mrf.mxu1 }
 0x19f   : > { %v6549_v6 = vpop.f32.mrf.mxu0 }
 0x1a0   : > { %v6547_v57 = vpop.f32.mrf.mxu1  ;;  %6997 = vst [vmem:[#allocation30_spill] sm:$0xff] %v6549_v6 }
 0x1a1   : > { %v6553_v29 = vpop.f32.mrf.mxu0 }
 0x1a2   : > { %v6551_v16 = vpop.f32.mrf.mxu1  ;;  %6999 = vst [vmem:[#allocation32_spill] sm:$0xff] %v6553_v29 }
 0x1a3   : > { %6998 = vst [vmem:[#allocation31_spill] sm:$0xff] %v6551_v16  ;;  %v6557_v56 = vpop.f32.mrf.mxu0 }
 0x1a4   : > { %v6555_v37 = vpop.f32.mrf.mxu1  ;;  %7001 = vst [vmem:[#allocation35_spill] sm:$0xff] %v6557_v56 }
 0x1a5   : > { %7000 = vst [vmem:[#allocation34_spill] sm:$0xff] %v6555_v37  ;;  %v6561_v34 = vpop.f32.mrf.mxu0 }
 0x1a6   : > { %v6559_v58 = vpop.f32.mrf.mxu1  ;;  %7002 = vst [vmem:[#allocation33_spill] sm:$0xff] %v6561_v34 }
 0x1a7   : > { %v6565_v49 = vpop.f32.mrf.mxu0 }
 0x1a8   : > { %v6563_v62 = vpop.f32.mrf.mxu1  ;;  %7004 = vst [vmem:[#allocation7_spill] sm:$0xff] %v6565_v49 }
 0x1a9   : > { %7003 = vst [vmem:[#allocation6_spill] sm:$0xff] %v6563_v62  ;;  %v6569_v52 = vpop.f32.mrf.mxu0 }
 0x1aa   : > { %v6567_v47 = vpop.f32.mrf.mxu1  ;;  %7006 = vst [vmem:[#allocation36_spill] sm:$0xff] %v6569_v52 }
 0x1ab   : > { %7005 = vst [vmem:[#allocation8_spill] sm:$0xff] %v6567_v47  ;;  %v6573_v16 = vpop.f32.mrf.mxu0 }
 0x1ac   : > { %v6571_v6 = vpop.f32.mrf.mxu1  ;;  %7008 = vst [vmem:[#allocation9_spill] sm:$0xff] %v6573_v16 }
 0x1ad   : > { %7007 = vst [vmem:[#allocation10_spill] sm:$0xff] %v6571_v6  ;;  %v6577_v37 = vpop.f32.mrf.mxu0 }
 0x1ae   : > { %v6575_v29 = vpop.f32.mrf.mxu1  ;;  %7010 = vst [vmem:[#allocation12_spill] sm:$0xff] %v6577_v37 }
 0x1af   : > { %7009 = vst [vmem:[#allocation5_spill] sm:$0xff] %v6575_v29  ;;  %v6581_v34 = vpop.f32.mrf.mxu0 }
 0x1b0   : > { %v6579_v56 = vpop.f32.mrf.mxu1  ;;  %7012 = vst [vmem:[#allocation13_spill] sm:$0xff] %v6581_v34 }
 0x1b1   : > { %7011 = vst [vmem:[#allocation11_spill] sm:$0xff] %v6579_v56  ;;  %v6585_v49 = vpop.f32.mrf.mxu0  ;;  %v2436_v56 = vadd.f32 %v4873_v48, %v6388_v32  ;;  %v2437_v48 = vadd.f32 %v6491_v24, %v6397_v46  ;;  %v2439_v46 = vadd.f32 %v6499_v18, %v6403_v8 }
 0x1b2   : > { %v6583_v62 = vpop.f32.mrf.mxu1  ;;  %7014 = vst [vmem:[#allocation15_spill] sm:$0xff] %v6585_v49  ;;  %v2435_v49 = vadd.f32 %v2276_v10, %v6391_v11  ;;  %v2440_v11 = vadd.f32 %v6495_v26, %v6400_v28 }
 0x1b3   : > { %7013 = vst [vmem:[#allocation14_spill] sm:$0xff] %v6583_v62  ;;  %v6589_v52 = vpop.f32.mrf.mxu0 }
 0x1b4   : > { %v6587_v47 = vpop.f32.mrf.mxu1  ;;  %7016 = vst [vmem:[#allocation38_spill] sm:$0xff] %v6589_v52  ;;  %v2828_v32 = vadd.f32 %v6485_v53, %v2435_v49  ;;  %v2830_v53 = vadd.f32 %v6493_v9, %v2437_v48  ;;  %v2444_v48 = vadd.f32 %v6511_v22, %v6412_v17 }
 0x1b5   : > { %7015 = vst [vmem:[#allocation37_spill] sm:$0xff] %v6587_v47  ;;  %v6593_v16 = vpop.f32.mrf.mxu0 }
 0x1b6   : > { %v6591_v6 = vpop.f32.mrf.mxu1  ;;  %7018 = vst [vmem:[#allocation40_spill] sm:$0xff] %v6593_v16  ;;  %v2829_v16 = vadd.f32 %v6481_v35, %v2436_v56  ;;  %v6623_v56 = vld [vmem:[%s6833_s2] ss:$0 sm:$0xff] }
 0x1b7   : > { %7017 = vst [vmem:[#allocation39_spill] sm:$0xff] %v6591_v6  ;;  %v6597_v37 = vpop.f32.mrf.mxu0 }
 0x1b8   : > { %v6595_v29 = vpop.f32.mrf.mxu1  ;;  %7020 = vst [vmem:[#allocation42_spill] sm:$0xff] %v6597_v37 }
 0x1b9   : > { %7019 = vst [vmem:[#allocation41_spill] sm:$0xff] %v6595_v29  ;;  %v6602_v62 = vpop.f32.mrf.mxu0  ;;  %v2438_v29 = vadd.f32 %v6487_v3, %v6394_v23 }
 0x1ba   : > { %v6600_v34 = vpop.f32.mrf.mxu1  ;;  %7022 = vst [vmem:[#allocation44_spill] sm:$0xff] %v6602_v62 }
 0x1bb   : > { %7021 = vst [vmem:[#allocation43_spill] sm:$0xff] %v6600_v34  ;;  %v6607_v52 = vpop.f32.mrf.mxu0  ;;  %v2831_v10 = vadd.f32 %v6489_v39, %v2438_v29  ;;  %v2442_v29 = vadd.f32 %v6503_v63, %v6406_v27  ;;  %v2832_v39 = vadd.f32 %v6501_v7, %v2439_v46 }
 0x1bc   : > { %v6605_v47 = vpop.f32.mrf.mxu1  ;;  %7024 = vst [vmem:[#allocation46_spill] sm:$0xff] %v6607_v52  ;;  %v2833_v52 = vadd.f32 %v6497_v15, %v2440_v11  ;;  %v2441_v15 = vadd.f32 %v6507_v61, %v6409_v30  ;;  %v2443_v30 = vadd.f32 %v6515_v50, %v6415_v55 }
 0x1bd   : > { %7023 = vst [vmem:[#allocation45_spill] sm:$0xff] %v6605_v47  ;;  %v5023_v37 = vpop.f32.mrf.mxu0 }
 0x1be   : > { %v4973_v6 = vpop.f32.mrf.mxu1 }
 0x1bf   : > { %v3219_v62 = vadd.f32 %v4973_v6, %v2829_v16  ;;  %v3449_v23 = vpop.f32.mrf.mxu0 }
 0x1c0   : > { %v3059_v35 = vpop.f32.mrf.mxu1 }
 0x1c1   : > { %v3609_v3 = vadd.f32 %v5023_v37, %v3219_v62  ;;  %v3218_v49 = vadd.f32 %v3059_v35, %v2828_v32  ;;  %v5026_v6 = vpop.f32.mrf.mxu0 }
 0x1c2   : > { %v4976_v16 = vpop.f32.mrf.mxu1 }
 0x1c3   : > { %v3648_v28 = vadd.f32 %v6623_v56, %v3609_v3  ;;  %v3608_v24 = vadd.f32 %v3449_v23, %v3218_v49  ;;  %v3221_v26 = vadd.f32 %v4976_v16, %v2831_v10  ;;  %v3459_v34 = vpop.f32.mrf.mxu0  ;;  %v2446_v16 = vadd.f32 %v6519_v13, %v6418_v14 }
 0x1c4   : > { %v3069_v47 = vpop.f32.mrf.mxu1  ;;  %v2448_v14 = vadd.f32 %v6527_v31, %v6424_v60 }
 0x1c5   : > { %3680 = vst [vmem:[%s6633_s9 + $0x8] sm:$0xff] %v3648_v28  ;;  %v3647_v8 = vadd.f32 %v6623_v56, %v3608_v24  ;;  %v3611_v62 = vadd.f32 %v5026_v6, %v3221_v26  ;;  %v3220_v37 = vadd.f32 %v3069_v47, %v2830_v53  ;;  %v5029_v18 = vpop.f32.mrf.mxu0  ;;  %v2835_v47 = vadd.f32 %v6505_v41, %v2442_v29 }
 0x1c6   : > { %v4979_v9 = vpop.f32.mrf.mxu1  ;;  %v2837_v41 = vadd.f32 %v6513_v12, %v2444_v48  ;;  %v2445_v24 = vadd.f32 %v6523_v25, %v6421_v51  ;;  %v2447_v51 = vadd.f32 %v6531_v19, %v6427_v42 }
 0x1c7   : > { %3679 = vst [vmem:[%s6633_s9] sm:$0xff] %v3647_v8  ;;  %v3650_v27 = vadd.f32 %v6623_v56, %v3611_v62  ;;  %v3610_v63 = vadd.f32 %v3459_v34, %v3220_v37  ;;  %v3223_v32 = vadd.f32 %v4979_v9, %v2833_v52  ;;  %v3469_v35 = vpop.f32.mrf.mxu0  ;;  %v2834_v52 = vadd.f32 %v6509_v36, %v2441_v15 }
 0x1c8   : > { %v3079_v11 = vpop.f32.mrf.mxu1  ;;  %v2836_v36 = vadd.f32 %v6517_v59, %v2443_v30  ;;  %v2839_v62 = vadd.f32 %v6521_v45, %v2446_v16  ;;  %v2841_v45 = vadd.f32 %v6529_v4, %v2448_v14 }
 0x1c9   : > { %3682 = vst [vmem:[%s6633_s9 + $0x18] sm:$0xff] %v3650_v27  ;;  %v3649_v7 = vadd.f32 %v6623_v56, %v3610_v63  ;;  %v3613_v23 = vadd.f32 %v5029_v18, %v3223_v32  ;;  %v3222_v10 = vadd.f32 %v3079_v11, %v2832_v39  ;;  %v5032_v3 = vpop.f32.mrf.mxu0  ;;  %v2838_v18 = vadd.f32 %v6525_v40, %v2445_v24 }
 0x1ca   : > { %v4982_v61 = vpop.f32.mrf.mxu1  ;;  %v2450_v32 = vadd.f32 %v6535_v2, %v6430_v1  ;;  %v2840_v40 = vadd.f32 %v6533_v0, %v2447_v51  ;;  %v2452_v1 = vadd.f32 %v6543_v33, %v6436_v54 }
 0x1cb   : > { %3681 = vst [vmem:[%s6633_s9 + $0x10] sm:$0xff] %v3649_v7  ;;  %v3652_v17 = vadd.f32 %v6623_v56, %v3613_v23  ;;  %v3612_v34 = vadd.f32 %v3469_v35, %v3222_v10  ;;  %v3225_v22 = vadd.f32 %v4982_v61, %v2835_v47  ;;  %v3479_v46 = vpop.f32.mrf.mxu0  ;;  %v2449_v47 = vadd.f32 %v6539_v5, %v6433_v38 }
 0x1cc   : > { %v3089_v49 = vpop.f32.mrf.mxu1  ;;  %v2843_v30 = vadd.f32 %v6537_v43, %v2450_v32  ;;  %v2451_v38 = vadd.f32 %v6547_v57, %v6439_v44  ;;  %v2845_v43 = vadd.f32 %v6545_v21, %v2452_v1  ;;  %v7035_v32 = vld [vmem:[#allocation33_spill] sm:$0xff] }
 0x1cd   : > { %3684 = vst [vmem:[%s6633_s9 + $0x28] sm:$0xff] %v3652_v17  ;;  %v3651_v55 = vadd.f32 %v6623_v56, %v3612_v34  ;;  %v3615_v50 = vadd.f32 %v5032_v3, %v3225_v22  ;;  %v3224_v6 = vadd.f32 %v3089_v49, %v2834_v52  ;;  %v5035_v28 = vpop.f32.mrf.mxu0  ;;  %v2842_v17 = vadd.f32 %v6541_v20, %v2449_v47  ;;  %v7025_v49 = vld [vmem:[#allocation16_spill] sm:$0xff]  ;;  %v7027_v20 = vld [vmem:[#allocation30_spill] sm:$0xff] }
 0x1ce   : > { %v4985_v53 = vpop.f32.mrf.mxu1 }
 0x1cf   : > { %3683 = vst [vmem:[%s6633_s9 + $0x20] sm:$0xff] %v3651_v55  ;;  %v3654_v12 = vadd.f32 %v6623_v56, %v3615_v50  ;;  %v3614_v26 = vadd.f32 %v3479_v46, %v3224_v6  ;;  %v3227_v29 = vadd.f32 %v4985_v53, %v2837_v41  ;;  %v3489_v8 = vpop.f32.mrf.mxu0  ;;  %v7026_v46 = vld [vmem:[#allocation31_spill] sm:$0xff]  ;;  %v2844_v50 = vadd.f32 %v7027_v20, %v2451_v38  ;;  %v7028_v53 = vld [vmem:[#allocation17_spill] sm:$0xff] }
 0x1d0   : > { %v3099_v13 = vpop.f32.mrf.mxu1  ;;  %v2454_v16 = vadd.f32 %v7026_v46, %v7025_v49 }
 0x1d1   : > { %3686 = vst [vmem:[%s6633_s9 + $0x38] sm:$0xff] %v3654_v12  ;;  %v3653_v59 = vadd.f32 %v6623_v56, %v3614_v26  ;;  %v3617_v37 = vadd.f32 %v5035_v28, %v3227_v29  ;;  %v3226_v39 = vadd.f32 %v3099_v13, %v2836_v36  ;;  %v5038_v9 = vpop.f32.mrf.mxu0  ;;  %v7029_v28 = vld [vmem:[#allocation34_spill] sm:$0xff] }
 0x1d2   : > { %v4988_v25 = vpop.f32.mrf.mxu1  ;;  %v2453_v24 = vadd.f32 %v7029_v28, %v7028_v53  ;;  %v7030_v29 = vld [vmem:[#allocation18_spill] sm:$0xff] }
 0x1d3   : > { %3685 = vst [vmem:[%s6633_s9 + $0x30] sm:$0xff] %v3653_v59  ;;  %v3656_v60 = vadd.f32 %v6623_v56, %v3617_v37  ;;  %v3616_v31 = vadd.f32 %v3489_v8, %v3226_v39  ;;  %v3229_v15 = vadd.f32 %v4988_v25, %v2839_v62  ;;  %v3499_v63 = vpop.f32.mrf.mxu0  ;;  %v2456_v14 = vadd.f32 %v6559_v58, %v7030_v29  ;;  %v7031_v62 = vld [vmem:[#allocation32_spill] sm:$0xff]  ;;  %v7032_v25 = vld [vmem:[#allocation19_spill] sm:$0xff] }
 0x1d4   : > { %v3109_v27 = vpop.f32.mrf.mxu1  ;;  %v2847_v59 = vadd.f32 %v7031_v62, %v2454_v16  ;;  %v7044_v16 = vld [vmem:[#allocation23_spill] sm:$0xff]  ;;  %v7048_v29 = vld [vmem:[#allocation24_spill] sm:$0xff] }
 0x1d5   : > { %3688 = vst [vmem:[%s6633_s9 + $0x48] sm:$0xff] %v3656_v60  ;;  %v3655_v42 = vadd.f32 %v6623_v56, %v3616_v31  ;;  %v3619_v19 = vadd.f32 %v5038_v9, %v3229_v15  ;;  %v3228_v48 = vadd.f32 %v3109_v27, %v2838_v18  ;;  %v5041_v35 = vpop.f32.mrf.mxu0  ;;  %v7033_v9 = vld [vmem:[#allocation6_spill] sm:$0xff]  ;;  %v7034_v15 = vld [vmem:[#allocation35_spill] sm:$0xff] }
 0x1d6   : > { %v4991_v11 = vpop.f32.mrf.mxu1  ;;  %v2455_v18 = vadd.f32 %v7033_v9, %v7032_v25  ;;  %v7051_v9 = vld [vmem:[#allocation25_spill] sm:$0xff] }
 0x1d7   : > { %3687 = vst [vmem:[%s6633_s9 + $0x40] sm:$0xff] %v3655_v42  ;;  %v3658_v4 = vadd.f32 %v6623_v56, %v3619_v19  ;;  %v3618_v7 = vadd.f32 %v3499_v63, %v3228_v48  ;;  %v3231_v23 = vadd.f32 %v4991_v11, %v2841_v45  ;;  %v3509_v10 = vpop.f32.mrf.mxu0  ;;  %v2846_v45 = vadd.f32 %v7034_v15, %v2453_v24  ;;  %v7037_v11 = vld [vmem:[#allocation8_spill] sm:$0xff] }
 0x1d8   : > { %v3119_v2 = vpop.f32.mrf.mxu1  ;;  %v2849_v42 = vadd.f32 %v7035_v32, %v2456_v14  ;;  %v7047_v24 = vld [vmem:[#allocation12_spill] sm:$0xff]  ;;  %v7049_v14 = vld [vmem:[#allocation14_spill] sm:$0xff] }
 0x1d9   : > { %3690 = vst [vmem:[%s6633_s9 + $0x58] sm:$0xff] %v3658_v4  ;;  %v3657_v0 = vadd.f32 %v6623_v56, %v3618_v7  ;;  %v3621_v61 = vadd.f32 %v5041_v35, %v3231_v23  ;;  %v3230_v3 = vadd.f32 %v3119_v2, %v2840_v40  ;;  %v5044_v52 = vpop.f32.mrf.mxu0  ;;  %v7036_v40 = vld [vmem:[#allocation20_spill] sm:$0xff]  ;;  %v7038_v23 = vld [vmem:[#allocation7_spill] sm:$0xff] }
 0x1da   : > { %v4994_v5 = vpop.f32.mrf.mxu1  ;;  %v2458_v35 = vadd.f32 %v7037_v11, %v7036_v40  ;;  %v2848_v1 = vadd.f32 %v7038_v23, %v2455_v18  ;;  %v7052_v18 = vld [vmem:[#allocation37_spill] sm:$0xff] }
 0x1db   : > { %3689 = vst [vmem:[%s6633_s9 + $0x50] sm:$0xff] %v3657_v0  ;;  %v3660_v54 = vadd.f32 %v6623_v56, %v3621_v61  ;;  %v3620_v33 = vadd.f32 %v3509_v10, %v3230_v3  ;;  %v3233_v34 = vadd.f32 %v4994_v5, %v2843_v30  ;;  %v3519_v41 = vpop.f32.mrf.mxu0  ;;  %v7039_v30 = vld [vmem:[#allocation21_spill] sm:$0xff]  ;;  %v7040_v0 = vld [vmem:[#allocation10_spill] sm:$0xff] }
 0x1dc   : > { %v3129_v22 = vpop.f32.mrf.mxu1  ;;  %v2457_v61 = vadd.f32 %v7040_v0, %v7039_v30 }
 0x1dd   : > { %3692 = vst [vmem:[%s6633_s9 + $0x68] sm:$0xff] %v3660_v54  ;;  %v3659_v44 = vadd.f32 %v6623_v56, %v3620_v33  ;;  %v3623_v57 = vadd.f32 %v5044_v52, %v3233_v34  ;;  %v3232_v55 = vadd.f32 %v3129_v22, %v2842_v17  ;;  %v5047_v36 = vpop.f32.mrf.mxu0  ;;  %v7041_v52 = vld [vmem:[#allocation22_spill] sm:$0xff]  ;;  %v7042_v17 = vld [vmem:[#allocation5_spill] sm:$0xff] }
 0x1de   : > { %v4997_v6 = vpop.f32.mrf.mxu1  ;;  %v2460_v54 = vadd.f32 %v7042_v17, %v7041_v52  ;;  %v7060_v17 = vld [vmem:[#allocation28_spill] sm:$0xff] }
 0x1df   : > { %3691 = vst [vmem:[%s6633_s9 + $0x60] sm:$0xff] %v3659_v44  ;;  %v3662_v21 = vadd.f32 %v6623_v56, %v3623_v57  ;;  %v3622_v12 = vadd.f32 %v3519_v41, %v3232_v55  ;;  %v3235_v26 = vadd.f32 %v4997_v6, %v2845_v43  ;;  %v3529_v8 = vpop.f32.mrf.mxu0  ;;  %v7043_v43 = vld [vmem:[#allocation36_spill] sm:$0xff]  ;;  %v7045_v44 = vld [vmem:[#allocation11_spill] sm:$0xff] }
 0x1e0   : > { %v3139_v13 = vpop.f32.mrf.mxu1  ;;  %v2851_v22 = vadd.f32 %v7043_v43, %v2458_v35  ;;  %v2459_v57 = vadd.f32 %v7045_v44, %v7044_v16  ;;  %v7063_v44 = vld [vmem:[#allocation29_spill] sm:$0xff] }
 0x1e1   : > { %3694 = vst [vmem:[%s6633_s9 + $0x78] sm:$0xff] %v3662_v21  ;;  %v3661_v37 = vadd.f32 %v6623_v56, %v3622_v12  ;;  %v3625_v39 = vadd.f32 %v5047_v36, %v3235_v26  ;;  %v3234_v51 = vadd.f32 %v3139_v13, %v2844_v50  ;;  %v5050_v31 = vpop.f32.mrf.mxu0  ;;  %v7046_v50 = vld [vmem:[#allocation9_spill] sm:$0xff]  ;;  %v2853_v21 = vadd.f32 %v7047_v24, %v2460_v54  ;;  %v7061_v54 = vld [vmem:[#allocation43_spill] sm:$0xff] }
 0x1e2   : > { %v5000_v60 = vpop.f32.mrf.mxu1  ;;  %v2850_v6 = vadd.f32 %v7046_v50, %v2457_v61  ;;  %v2462_v13 = vadd.f32 %v7049_v14, %v7048_v29 }
 0x1e3   : > { %3693 = vst [vmem:[%s6633_s9 + $0x70] sm:$0xff] %v3661_v37  ;;  %v3664_v58 = vadd.f32 %v6623_v56, %v3625_v39  ;;  %v3624_v27 = vadd.f32 %v3529_v8, %v3234_v51  ;;  %v3237_v63 = vadd.f32 %v5000_v60, %v2847_v59  ;;  %v3539_v48 = vpop.f32.mrf.mxu0  ;;  %v7050_v37 = vld [vmem:[#allocation13_spill] sm:$0xff]  ;;  %v2461_v60 = vadd.f32 %v7052_v18, %v7051_v9 }
 0x1e4   : > { %v3149_v19 = vpop.f32.mrf.mxu1  ;;  %v2852_v39 = vadd.f32 %v7050_v37, %v2459_v57  ;;  %v7064_v57 = vld [vmem:[#allocation45_spill] sm:$0xff] }
 0x1e5   : > { %3696 = vst [vmem:[%s6633_s9 + $0x88] sm:$0xff] %v3664_v58  ;;  %v3663_v47 = vadd.f32 %v6623_v56, %v3624_v27  ;;  %v3627_v4 = vadd.f32 %v5050_v31, %v3237_v63  ;;  %v3236_v7 = vadd.f32 %v3149_v19, %v2846_v45  ;;  %v5053_v10 = vpop.f32.mrf.mxu0  ;;  %v7053_v58 = vld [vmem:[#allocation26_spill] sm:$0xff]  ;;  %v7054_v27 = vld [vmem:[#allocation39_spill] sm:$0xff] }
 0x1e6   : > { %v5003_v2 = vpop.f32.mrf.mxu1  ;;  %v2464_v63 = vadd.f32 %v7054_v27, %v7053_v58  ;;  %v7055_v19 = vld [vmem:[#allocation15_spill] sm:$0xff] }
 0x1e7   : > { %3695 = vst [vmem:[%s6633_s9 + $0x80] sm:$0xff] %v3663_v47  ;;  %v3666_v3 = vadd.f32 %v6623_v56, %v3627_v4  ;;  %v3626_v38 = vadd.f32 %v3539_v48, %v3236_v7  ;;  %v3239_v5 = vadd.f32 %v5003_v2, %v2849_v42  ;;  %v3549_v34 = vpop.f32.mrf.mxu0  ;;  %v2855_v48 = vadd.f32 %v7055_v19, %v2462_v13  ;;  %v7056_v47 = vld [vmem:[#allocation27_spill] sm:$0xff]  ;;  %v7057_v4 = vld [vmem:[#allocation41_spill] sm:$0xff]  ;;  %v7058_v2 = vld [vmem:[#allocation38_spill] sm:$0xff] }
 0x1e8   : > { %v3159_v33 = vpop.f32.mrf.mxu1  ;;  %v2463_v7 = vadd.f32 %v7057_v4, %v7056_v47  ;;  %v7066_v13 = vld [vmem:[#allocation46_spill] sm:$0xff] }
 0x1e9   : > { %3698 = vst [vmem:[%s6633_s9 + $0x98] sm:$0xff] %v3666_v3  ;;  %v3665_v41 = vadd.f32 %v6623_v56, %v3626_v38  ;;  %v3629_v49 = vadd.f32 %v5053_v10, %v3239_v5  ;;  %v3238_v46 = vadd.f32 %v3159_v33, %v2848_v1  ;;  %v5056_v20 = vpop.f32.mrf.mxu0  ;;  %v2854_v10 = vadd.f32 %v7058_v2, %v2461_v60  ;;  %v7059_v3 = vld [vmem:[#allocation40_spill] sm:$0xff] }
 0x1ea   : > { %v5006_v55 = vpop.f32.mrf.mxu1  ;;  %v2857_v38 = vadd.f32 %v7059_v3, %v2464_v63  ;;  %v2466_v33 = vadd.f32 %v7061_v54, %v7060_v17 }
 0x1eb   : > { %3697 = vst [vmem:[%s6633_s9 + $0x90] sm:$0xff] %v3665_v41  ;;  %v3668_v36 = vadd.f32 %v6623_v56, %v3629_v49  ;;  %v3628_v53 = vadd.f32 %v3549_v34, %v3238_v46  ;;  %v3241_v28 = vadd.f32 %v5006_v55, %v2851_v22  ;;  %v3559_v26 = vpop.f32.mrf.mxu0  ;;  %v7062_v41 = vld [vmem:[#allocation42_spill] sm:$0xff]  ;;  %v2465_v55 = vadd.f32 %v7064_v57, %v7063_v44 }
 0x1ec   : > { %v3169_v12 = vpop.f32.mrf.mxu1  ;;  %v2856_v49 = vadd.f32 %v7062_v41, %v2463_v7 }
 0x1ed   : > { %3700 = vst [vmem:[%s6633_s9 + $0xa8] sm:$0xff] %v3668_v36  ;;  %v3667_v8 = vadd.f32 %v6623_v56, %v3628_v53  ;;  %v3631_v62 = vadd.f32 %v5056_v20, %v3241_v28  ;;  %v3240_v59 = vadd.f32 %v3169_v12, %v2850_v6  ;;  %v5059_v25 = vpop.f32.mrf.mxu0  ;;  %v7065_v28 = vld [vmem:[#allocation44_spill] sm:$0xff] }
 0x1ee   : > { %v5009_v51 = vpop.f32.mrf.mxu1  ;;  %v2859_v24 = vadd.f32 %v7065_v28, %v2466_v33 }
 0x1ef   : > { %3699 = vst [vmem:[%s6633_s9 + $0xa0] sm:$0xff] %v3667_v8  ;;  %v3670_v31 = vadd.f32 %v6623_v56, %v3631_v62  ;;  %v3630_v15 = vadd.f32 %v3559_v26, %v3240_v59  ;;  %v3243_v45 = vadd.f32 %v5009_v51, %v2853_v21  ;;  %v3569_v42 = vpop.f32.mrf.mxu0  ;;  %v2858_v8 = vadd.f32 %v7066_v13, %v2465_v55 }
 0x1f0   : > { %v3179_v32 = vpop.f32.mrf.mxu1 }
 0x1f1   : > { %3702 = vst [vmem:[%s6633_s9 + $0xb8] sm:$0xff] %v3670_v31  ;;  %v3669_v40 = vadd.f32 %v6623_v56, %v3630_v15  ;;  %v3633_v11 = vadd.f32 %v5059_v25, %v3243_v45  ;;  %v3242_v35 = vadd.f32 %v3179_v32, %v2852_v39  ;;  %v5062_v1 = vpop.f32.mrf.mxu0 }
 0x1f2   : > { %v5012_v23 = vpop.f32.mrf.mxu1 }
 0x1f3   : > { %3701 = vst [vmem:[%s6633_s9 + $0xb0] sm:$0xff] %v3669_v40  ;;  %v3672_v30 = vadd.f32 %v6623_v56, %v3633_v11  ;;  %v3632_v0 = vadd.f32 %v3569_v42, %v3242_v35  ;;  %v3245_v61 = vadd.f32 %v5012_v23, %v2855_v48  ;;  %v3579_v52 = vpop.f32.mrf.mxu0 }
 0x1f4   : > { %v3189_v5 = vpop.f32.mrf.mxu1 }
 0x1f5   : > { %3704 = vst [vmem:[%s6633_s9 + $0xc8] sm:$0xff] %v3672_v30  ;;  %v3671_v34 = vadd.f32 %v6623_v56, %v3632_v0  ;;  %v3635_v43 = vadd.f32 %v5062_v1, %v3245_v61  ;;  %v3244_v22 = vadd.f32 %v3189_v5, %v2854_v10  ;;  %v5065_v16 = vpop.f32.mrf.mxu0 }
 0x1f6   : > { %v5015_v46 = vpop.f32.mrf.mxu1 }
 0x1f7   : > { %3703 = vst [vmem:[%s6633_s9 + $0xc0] sm:$0xff] %v3671_v34  ;;  %v3674_v20 = vadd.f32 %v6623_v56, %v3635_v43  ;;  %v3634_v50 = vadd.f32 %v3579_v52, %v3244_v22  ;;  %v3247_v6 = vadd.f32 %v5015_v46, %v2857_v38  ;;  %v3589_v53 = vpop.f32.mrf.mxu0 }
 0x1f8   : > { %v3199_v36 = vpop.f32.mrf.mxu1 }
 0x1f9   : > { %3706 = vst [vmem:[%s6633_s9 + $0xd8] sm:$0xff] %v3674_v20  ;;  %v3673_v21 = vadd.f32 %v6623_v56, %v3634_v50  ;;  %v3637_v12 = vadd.f32 %v5065_v16, %v3247_v6  ;;  %v3246_v26 = vadd.f32 %v3199_v36, %v2856_v49  ;;  %v5068_v14 = vpop.f32.mrf.mxu0 }
 0x1fa   : > { %v5018_v29 = vpop.f32.mrf.mxu1 }
 0x1fb   : > { %3705 = vst [vmem:[%s6633_s9 + $0xd0] sm:$0xff] %v3673_v21  ;;  %v3676_v62 = vadd.f32 %v6623_v56, %v3637_v12  ;;  %v3636_v59 = vadd.f32 %v3589_v53, %v3246_v26  ;;  %v3249_v37 = vadd.f32 %v5018_v29, %v2859_v24  ;;  %v3599_v18 = vpop.f32.mrf.mxu0 }
 0x1fc   : > { %v3209_v39 = vpop.f32.mrf.mxu1 }
 0x1fd   : > { %3708 = vst [vmem:[%s6633_s9 + $0xe8] sm:$0xff] %v3676_v62  ;;  %v3675_v51 = vadd.f32 %v6623_v56, %v3636_v59  ;;  %v3639_v25 = vadd.f32 %v5068_v14, %v3249_v37  ;;  %v3248_v9 = vadd.f32 %v3209_v39, %v2858_v8 }
 0x1ff   : > { %3707 = vst [vmem:[%s6633_s9 + $0xe0] sm:$0xff] %v3675_v51  ;;  %v3678_v60 = vadd.f32 %v6623_v56, %v3639_v25  ;;  %v3638_v31 = vadd.f32 %v3599_v18, %v3248_v9 }
 0x201   : > { %3710 = vst [vmem:[%s6633_s9 + $0xf8] sm:$0xff] %v3678_v60  ;;  %v3677_v15 = vadd.f32 %v6623_v56, %v3638_v31 }
 0x203   : > { %3709 = vst [vmem:[%s6633_s9 + $0xf0] sm:$0xff] %v3677_v15 }
 0x204   : > { %5142 = shalt.err (!%p5139_p5)
}
 0x205   : > { %s5143_s29 = scalar_lea.hbm %s6777_s21, 4096  ;;  %s5147_s5 = scalar_lea.hbm %s6834_s3, 8192 }
 0x206   : > { %p5144_p6 = scmp.ne.s32.totalorder %s6777_s21, %s5143_s29  ;;  %p5148_p10 = scmp.lt.s32.totalorder %s6777_s21, %s6834_s3 }
 0x207   : > { %p5149_p11 = scmp.lt.s32.totalorder %s5147_s5, %s5143_s29 }
 0x208   : > { %p5145_p7 = pnand %p5144_p6, %p5270_p4 }
 0x209   : > { %p5150_p12 = por %p5149_p11, %p5148_p10 }
 0x20a   : > { %p5146_p9 = pneg %p5145_p7 }
 0x20c   : > { %p5151_p13 = pnand %p5150_p12, %p5146_p9 }
 0x20e   : > { %5154 = shalt.err (!%p5151_p13)
}
 0x20f   : > { %s5208_s8 = smov 128   ;;  %s5209_s9 = smov 8  }
 0x210   : > { %5072 = dma.vmem_to_hbm [thread:$0]  (%p5270_p4), %s6779_s11, 4096, %s6777_s21, %s6786_s15, %s5208_s8, %s5208_s8, %s5209_s9  }
 0x211 PF: > { %p5078_p0 = scmp.ge.s32.totalorder %s5205_s17, 2  ;;  %s3743_s10 = sand.u32 1, %s5185_s12  }
 0x212   : > { %s3744_s18 = scalar_lea.sflag [#allocation3], %s3743_s10 }
 0x213   : > { %p5075_p1 = pnand %p5078_p0, %p5277_p8 }
 0x215   : > { %p5076_p2 = pneg %p5075_p1 }
 0x217   : > { %5180 = dma.done.wait (%p5076_p2), %s3744_s18, 4096  }
 0x218   : > { %5182 = vsyncadd (%p5076_p2), %s3744_s18, 4294963200  ;;  %s16_s17 = sadd.s32 1, %s5205_s17   ;;  %s7067_s12 = smov %s5189_s13 }
 0x219   : > { %p13_p3 = scmp.ge.s32.totalorder %s16_s17, 4   ;;  %s7068_s13 = smov %s5193_s14 }
 0x21a   : > { %s7069_s14 = smov %s5283_s25  ;;  %s7070_s15 = smov %s5201_s16 }
 0x21b   : > { %s7071_s16 = smov %s7073_s20  ;;  %15 = sbr.rel (!%p13_p3) target bundleno = 4 (0x4), region = 78 }
 0x220   :  { %3749 = vsyncpa [#allocation3], 1 }
 0x221   :  { %3751 = vsyncpa [#allocation3 + $0x1], 1 }

</bundles_post_ra>
